<compile_context>
chip_gen: v7x
topology: tpu7x:2x2x1
jax: 0.10.0
libtpu: 0.0.40
codegen_flags: <defaults>
</compile_context>

<pallas_src>
import functools

import jax
import jax.numpy as jnp
from jax.experimental import pallas as pl
from jax.experimental.pallas import tpu as pltpu


def _round_up(n, m):
    return ((n + m - 1) // m) * m


def _pick_batch_tile(batch, block_b):
    """Sublane-dense batch tile; >=2 grid steps when possible (megacore/2-TC)."""
    b8 = _round_up(batch, 8)
    if b8 >= 16:
        tb = min(block_b, _round_up(b8 // 2, 8))
    else:
        tb = b8
    tb = max(tb, 8)
    b_pad = _round_up(b8, tb)
    return tb, b_pad


# ---------------------------------------------------------------------------
# Path 1: small/moderate vocab — multi-hot counts @ W on the MXU, vocab-tiled.
# ---------------------------------------------------------------------------

def _features_linear_counts_kernel(x_ref, w_ref, b_ref, o_ref, acc_ref, *,
                                   vocab, tv, chunk):
    """One (batch tile, vocab tile) step:  acc += multi_hot(x)[:, tile] @ W[tile].

    x_ref:   (TB, F)  int32 indices (VMEM tile)
    w_ref:   (TV, D)  f32 vocab tile of the embedding table
    b_ref:   (1, D)   f32 bias
    o_ref:   (TB, D)  f32 output tile (written at last vocab step)
    acc_ref: (TB, D)  f32 VMEM accumulator, persistent across vocab steps
    """
    v = pl.program_id(1)

    @pl.when(v == 0)
    def _():
        acc_ref[...] = jnp.zeros_like(acc_ref)

    # In-kernel clamp (PyTorch would error on OOB; we clamp like the previous
    # version, but without a separate host-side XLA pass).
    idx = jnp.clip(x_ref[...], 0, vocab - 1)                 # (TB, F) int32
    tb, num_fields = idx.shape
    d = w_ref.shape[1]
    base = v * tv                                            # global vocab offset

    lane_iota = jax.lax.broadcasted_iota(jnp.int32, (tb, chunk), 1)

    # Process the TV-wide vocab tile in 128-lane chunks: accumulate the F
    # compares for a chunk in int32 registers, convert to f32 once, and feed the
    # MXU; the (TB, D) accumulator is touched once per grid step.
    partial = jnp.zeros((tb, d), jnp.float32)
    for c in range(tv // chunk):                             # static unroll
        chunk_ids = lane_iota + (base + c * chunk)
        cnt = jnp.zeros((tb, chunk), jnp.int32)
        for f in range(num_fields):                          # static unroll, F small
            cnt = cnt + (idx[:, f:f + 1] == chunk_ids).astype(jnp.int32)
        partial = partial + jnp.dot(
            cnt.astype(jnp.float32),
            w_ref[c * chunk:(c + 1) * chunk, :],
            preferred_element_type=jnp.float32,
            precision=jax.lax.Precision.HIGHEST)

    acc_ref[...] += partial

    @pl.when(v == pl.num_programs(1) - 1)
    def _():
        o_ref[...] = (acc_ref[...] + b_ref[...]).astype(o_ref.dtype)


def _features_linear_counts(x, weight, bias2d, *, block_b):
    B, F = x.shape
    V, D = weight.shape
    itemsize = jnp.dtype(weight.dtype).itemsize

    tb, b_pad = _pick_batch_tile(B, block_b)
    if b_pad != B:
        x = jnp.pad(x, ((0, b_pad - B), (0, 0)))             # row-0 gathers, sliced off

    chunk = 128
    tv = min(512, _round_up(V, chunk))                       # vocab tile (lane-dense chunks)
    v_pad = _round_up(V, tv)
    if v_pad != V:
        weight = jnp.pad(weight, ((0, v_pad - V), (0, 0)))   # zero rows, never matched

    n_bt, n_vt = b_pad // tb, v_pad // tv

    kernel = functools.partial(_features_linear_counts_kernel,
                               vocab=V, tv=tv, chunk=chunk)

    cost = pl.CostEstimate(
        flops=2 * b_pad * v_pad * D + b_pad * v_pad * F,
        transcendentals=0,
        bytes_accessed=(b_pad * F * 4) + (n_bt * v_pad * D * itemsize)
        + (b_pad * D * itemsize) + (D * itemsize))

    est_vmem = (2 * tb * F * 4 + 2 * tv * D * itemsize + 2 * D * itemsize
                + 2 * tb * D * itemsize + tb * D * 4)
    vmem_limit = int(min(128 * 1024 * 1024, max(4 * 1024 * 1024, 8 * est_vmem)))

    out = pl.pallas_call(
        kernel,
        out_shape=jax.ShapeDtypeStruct((b_pad, D), weight.dtype),
        grid_spec=pltpu.PrefetchScalarGridSpec(
            num_scalar_prefetch=0,
            grid=(n_bt, n_vt),                               # vocab (reduction) axis last
            in_specs=[
                pl.BlockSpec((tb, F), lambda i, v: (i, 0)),  # batch tile of indices
                pl.BlockSpec((tv, D), lambda i, v: (v, 0)),  # streamed vocab tile of W
                pl.BlockSpec((1, D), lambda i, v: (0, 0)),   # bias (tiny, resident)
            ],
            out_specs=pl.BlockSpec((tb, D), lambda i, v: (i, 0)),
            scratch_shapes=[pltpu.VMEM((tb, D), jnp.float32)],
        ),
        compiler_params=pltpu.CompilerParams(
            dimension_semantics=("parallel", "arbitrary"),
            vmem_limit_bytes=vmem_limit),
        cost_estimate=cost,
    )(x, weight, bias2d)
    return out[:B]


# ---------------------------------------------------------------------------
# Path 2: large vocab — manual-DMA row gather (table stays in HBM).
# ---------------------------------------------------------------------------

def _features_linear_gather_kernel(idx_ref, tbl_ref, b_ref, o_ref, stage, sem, *,
                                   num_fields, vocab, nbuf):
    """One batch tile: gather TB*F rows from the HBM table with `nbuf`
    outstanding DMAs into a VMEM staging ring, sum per batch row on the VPU.

    idx_ref: SMEM (B_pad*F,) int32  flattened indices (scalar prefetch)
    tbl_ref: ANY  (V, D)            embedding table, never leaves HBM
    b_ref:   VMEM (1, D)            bias
    o_ref:   VMEM (TB, D)           output tile
    stage:   VMEM (nbuf, 1, D)      staging ring for gathered rows
    sem:     DMA semaphores (nbuf,)
    """
    i = pl.program_id(0)
    tb = o_ref.shape[0]
    n = tb * num_fields
    base = i * n

    def start(t, slot):
        r = jnp.clip(idx_ref[base + t], 0, vocab - 1)
        pltpu.make_async_copy(tbl_ref.at[pl.ds(r, 1)], stage.at[slot],
                              sem.at[slot]).start()

    def wait(slot):
        pltpu.make_async_copy(tbl_ref.at[pl.ds(0, 1)], stage.at[slot],
                              sem.at[slot]).wait()

    for s in range(min(nbuf, n)):                            # prime the ring
        start(s, s)

    bias_row = b_ref[...]                                    # (1, D)

    def body(b, carry):
        row = bias_row
        for f in range(num_fields):                          # static unroll, F small
            t = b * num_fields + f
            slot = jax.lax.rem(t, nbuf)
            wait(slot)
            row = row + stage[slot]

            @pl.when(t + nbuf < n)
            def _():
                start(t + nbuf, slot)                        # refill the slot just consumed
        o_ref[pl.ds(b, 1), :] = row.astype(o_ref.dtype)
        return carry

    jax.lax.fori_loop(0, tb, body, 0)


def _features_linear_gather(x, weight, bias2d, *, block_b, nbuf=4):
    B, F = x.shape
    V, D = weight.shape
    itemsize = jnp.dtype(weight.dtype).itemsize

    tb, b_pad = _pick_batch_tile(B, min(block_b, 128))
    if b_pad != B:
        x = jnp.pad(x, ((0, b_pad - B), (0, 0)))
    idx_flat = x.reshape(-1)                                 # (b_pad*F,) -> SMEM

    kernel = functools.partial(_features_linear_gather_kernel,
                               num_fields=F, vocab=V, nbuf=nbuf)

    cost = pl.CostEstimate(
        flops=b_pad * F * D,
        transcendentals=0,
        bytes_accessed=(b_pad * F * 4) + (b_pad * F * D * itemsize)
        + (b_pad * D * itemsize) + (D * itemsize))

    est_vmem = 2 * tb * D * itemsize + nbuf * D * itemsize + 2 * D * itemsize
    vmem_limit = int(min(128 * 1024 * 1024, max(4 * 1024 * 1024, 8 * est_vmem)))

    out = pl.pallas_call(
        kernel,
        out_shape=jax.ShapeDtypeStruct((b_pad, D), weight.dtype),
        grid_spec=pltpu.PrefetchScalarGridSpec(
            num_scalar_prefetch=1,                           # idx_flat -> SMEM
            grid=(b_pad // tb,),
            in_specs=[
                pl.BlockSpec(memory_space=pl.ANY),           # table stays in HBM
                pl.BlockSpec((1, D), lambda i, idx: (0, 0)),
            ],
            out_specs=pl.BlockSpec((tb, D), lambda i, idx: (i, 0)),
            scratch_shapes=[
                pltpu.VMEM((nbuf, 1, D), weight.dtype),
                pltpu.SemaphoreType.DMA((nbuf,)),
            ],
        ),
        compiler_params=pltpu.CompilerParams(
            dimension_semantics=("parallel",),
            vmem_limit_bytes=vmem_limit),
        cost_estimate=cost,
    )(idx_flat, weight, bias2d)
    return out[:B]


# ---------------------------------------------------------------------------
# Public wrapper (dispatch by vocab size).
# ---------------------------------------------------------------------------

def features_linear(x, weight, bias, *, block_b=256, counts_path_max_vocab=4096):
    """Pallas equivalent of FeaturesLinear.forward: sum(Embedding(x), dim=1) + bias.

    x:      (batch, num_fields) integer indices
    weight: (field_dims, output_dim) float32 embedding table
    bias:   (output_dim,) float32
    returns (batch, output_dim) float32

    block_b: raise to 512-1024 on v5e/v6e (128 MiB VMEM) for better grid-step
    amortization; the default 256 also fits v7x's smaller VMEM.
    """
    B, F = x.shape
    V, D = weight.shape
    assert bias.shape == (D,)

    x = x.astype(jnp.int32)
    bias2d = bias.reshape(1, D).astype(weight.dtype)

    if V <= counts_path_max_vocab:
        # Multi-hot counts @ W wins for small vocabs (work ~ B*V*(F+2D)).
        return _features_linear_counts(x, weight, bias2d, block_b=block_b)
    # FM-scale vocabs: stream rows from HBM (work ~ B*F*D, table never resident).
    return _features_linear_gather(x, weight, bias2d, block_b=block_b)


if __name__ == "__main__":
    key = jax.random.PRNGKey(0)

    # ---- Test 1: counts path (multi-tile batch grid, 2 vocab tiles) ----
    B1, F1, V1, D1 = 20, 8, 700, 16
    k1, k2, k3, key = jax.random.split(key, 4)
    w1 = 0.1 * jax.random.normal(k1, (V1, D1), dtype=jnp.float32)
    b1 = 0.1 * jax.random.normal(k2, (D1,), dtype=jnp.float32)
    x1 = jax.random.randint(k3, (B1, F1), 0, V1, dtype=jnp.int32)

    out1 = jax.block_until_ready(features_linear(x1, w1, b1))
    ref1 = jnp.sum(w1[x1], axis=1) + b1[None, :]
    assert out1.shape == (B1, D1)
    assert jnp.allclose(out1, ref1, atol=1e-5, rtol=1e-5), (
        f"counts-path mismatch, max abs err {jnp.max(jnp.abs(out1 - ref1))}")

    # ---- Test 2: large-vocab gather path (manual HBM row DMAs) ----
    B2, F2, V2, D2 = 12, 5, 5000, 16
    k4, k5, k6, key = jax.random.split(key, 4)
    w2 = 0.1 * jax.random.normal(k4, (V2, D2), dtype=jnp.float32)
    b2 = 0.1 * jax.random.normal(k5, (D2,), dtype=jnp.float32)
    x2 = jax.random.randint(k6, (B2, F2), 0, V2, dtype=jnp.int32)

    out2 = jax.block_until_ready(features_linear(x2, w2, b2))
    ref2 = jnp.sum(w2[x2], axis=1) + b2[None, :]
    assert out2.shape == (B2, D2)
    assert jnp.allclose(out2, ref2, atol=1e-5, rtol=1e-5), (
        f"gather-path mismatch, max abs err {jnp.max(jnp.abs(out2 - ref2))}")

    print("KERNEL_OK")
</pallas_src>

<mosaic_0001>
module attributes {stable_mosaic.version = 11 : i64} {
  func.func @_features_linear_counts_kernel(%arg0: i32, %arg1: i32, %arg2: memref<16x8xi32, #tpu.memory_space<vmem>>, %arg3: memref<512x16xf32, #tpu.memory_space<vmem>>, %arg4: memref<1x16xf32, #tpu.memory_space<vmem>>, %arg5: memref<16x16xf32, #tpu.memory_space<vmem>>, %arg6: memref<16x16xf32, #tpu.memory_space<vmem>>) attributes {dimension_semantics = [#tpu.dimension_semantics<parallel>, #tpu.dimension_semantics<arbitrary>], iteration_bounds = array<i64: 2, 2>, scalar_prefetch = 0 : i64, scratch_operands = 1 : i64, tpu.core_type = #tpu.core_type<tc>, window_params = [{transform_indices = @transform_0, window_bounds = array<i64: 16, 8>}, {transform_indices = @transform_1, window_bounds = array<i64: 512, 16>}, {pipeline_mode = #tpu.pipeline_mode<synchronous>, transform_indices = @transform_2, window_bounds = array<i64: 1, 16>}, {transform_indices = @transform_3, window_bounds = array<i64: 16, 16>}]} {
    %c0_i32 = arith.constant 0 : i32
    %0 = arith.cmpi eq, %arg1, %c0_i32 : i32
    %1 = arith.extui %0 : i1 to i32
    %c0_i32_0 = arith.constant 0 : i32
    %2 = arith.cmpi ne, %1, %c0_i32_0 : i32
    scf.if %2 {
      %cst_22 = arith.constant 0.000000e+00 : f32
      %209 = vector.broadcast %cst_22 : f32 to vector<16x16xf32>
      %c0_23 = arith.constant 0 : index
      %c0_24 = arith.constant 0 : index
      %210 = vector.load %arg6[%c0_23, %c0_24] : memref<16x16xf32, #tpu.memory_space<vmem>>, vector<16x16xf32>
      tpu.vector_store %arg6[%c0_23, %c0_24], %209 {strides = array<i32>} : memref<16x16xf32, #tpu.memory_space<vmem>>, vector<16x16xf32>,
    } else {
    }
    %c0 = arith.constant 0 : index
    %c0_1 = arith.constant 0 : index
    %3 = vector.load %arg2[%c0, %c0_1] : memref<16x8xi32, #tpu.memory_space<vmem>>, vector<16x8xi32>
    %c0_i32_2 = arith.constant 0 : i32
    %c699_i32 = arith.constant 699 : i32
    %4 = vector.broadcast %c0_i32_2 : i32 to vector<16x8xi32>
    %5 = arith.maxsi %4, %3 : vector<16x8xi32>
    %6 = vector.broadcast %c699_i32 : i32 to vector<16x8xi32>
    %7 = arith.minsi %6, %5 : vector<16x8xi32>
    %c512_i32 = arith.constant 512 : i32
    %8 = arith.muli %arg1, %c512_i32 : i32
    %9 = tpu.iota {dimensions = array<i32: 1>} : vector<16x128xi32>
    %cst = arith.constant 0.000000e+00 : f32
    %10 = vector.broadcast %cst : f32 to vector<16x16xf32>
    %c0_i32_3 = arith.constant 0 : i32
    %11 = arith.addi %8, %c0_i32_3 : i32
    %12 = vector.broadcast %11 : i32 to vector<16x128xi32>
    %13 = arith.addi %9, %12 : vector<16x128xi32>
    %c0_i32_4 = arith.constant 0 : i32
    %14 = vector.broadcast %c0_i32_4 : i32 to vector<16x128xi32>
    %15 = vector.extract_strided_slice %7 {offsets = [0, 0], sizes = [16, 1], strides = [1, 1]} : vector<16x8xi32> to vector<16x1xi32>
    %16 = vector.broadcast %15 : vector<16x1xi32> to vector<16x128xi32>
    %17 = arith.cmpi eq, %16, %13 : vector<16x128xi32>
    %18 = arith.extui %17 : vector<16x128xi1> to vector<16x128xi32>
    %19 = arith.addi %14, %18 : vector<16x128xi32>
    %20 = vector.extract_strided_slice %7 {offsets = [0, 1], sizes = [16, 1], strides = [1, 1]} : vector<16x8xi32> to vector<16x1xi32>
    %21 = vector.broadcast %20 : vector<16x1xi32> to vector<16x128xi32>
    %22 = arith.cmpi eq, %21, %13 : vector<16x128xi32>
    %23 = arith.extui %22 : vector<16x128xi1> to vector<16x128xi32>
    %24 = arith.addi %19, %23 : vector<16x128xi32>
    %25 = vector.extract_strided_slice %7 {offsets = [0, 2], sizes = [16, 1], strides = [1, 1]} : vector<16x8xi32> to vector<16x1xi32>
    %26 = vector.broadcast %25 : vector<16x1xi32> to vector<16x128xi32>
    %27 = arith.cmpi eq, %26, %13 : vector<16x128xi32>
    %28 = arith.extui %27 : vector<16x128xi1> to vector<16x128xi32>
    %29 = arith.addi %24, %28 : vector<16x128xi32>
    %30 = vector.extract_strided_slice %7 {offsets = [0, 3], sizes = [16, 1], strides = [1, 1]} : vector<16x8xi32> to vector<16x1xi32>
    %31 = vector.broadcast %30 : vector<16x1xi32> to vector<16x128xi32>
    %32 = arith.cmpi eq, %31, %13 : vector<16x128xi32>
    %33 = arith.extui %32 : vector<16x128xi1> to vector<16x128xi32>
    %34 = arith.addi %29, %33 : vector<16x128xi32>
    %35 = vector.extract_strided_slice %7 {offsets = [0, 4], sizes = [16, 1], strides = [1, 1]} : vector<16x8xi32> to vector<16x1xi32>
    %36 = vector.broadcast %35 : vector<16x1xi32> to vector<16x128xi32>
    %37 = arith.cmpi eq, %36, %13 : vector<16x128xi32>
    %38 = arith.extui %37 : vector<16x128xi1> to vector<16x128xi32>
    %39 = arith.addi %34, %38 : vector<16x128xi32>
    %40 = vector.extract_strided_slice %7 {offsets = [0, 5], sizes = [16, 1], strides = [1, 1]} : vector<16x8xi32> to vector<16x1xi32>
    %41 = vector.broadcast %40 : vector<16x1xi32> to vector<16x128xi32>
    %42 = arith.cmpi eq, %41, %13 : vector<16x128xi32>
    %43 = arith.extui %42 : vector<16x128xi1> to vector<16x128xi32>
    %44 = arith.addi %39, %43 : vector<16x128xi32>
    %45 = vector.extract_strided_slice %7 {offsets = [0, 6], sizes = [16, 1], strides = [1, 1]} : vector<16x8xi32> to vector<16x1xi32>
    %46 = vector.broadcast %45 : vector<16x1xi32> to vector<16x128xi32>
    %47 = arith.cmpi eq, %46, %13 : vector<16x128xi32>
    %48 = arith.extui %47 : vector<16x128xi1> to vector<16x128xi32>
    %49 = arith.addi %44, %48 : vector<16x128xi32>
    %50 = vector.extract_strided_slice %7 {offsets = [0, 7], sizes = [16, 1], strides = [1, 1]} : vector<16x8xi32> to vector<16x1xi32>
    %51 = vector.broadcast %50 : vector<16x1xi32> to vector<16x128xi32>
    %52 = arith.cmpi eq, %51, %13 : vector<16x128xi32>
    %53 = arith.extui %52 : vector<16x128xi1> to vector<16x128xi32>
    %54 = arith.addi %49, %53 : vector<16x128xi32>
    %55 = arith.sitofp %54 : vector<16x128xi32> to vector<16x128xf32>
    %c0_5 = arith.constant 0 : index
    %c0_6 = arith.constant 0 : index
    %56 = vector.load %arg3[%c0_5, %c0_6] : memref<512x16xf32, #tpu.memory_space<vmem>>, vector<128x16xf32>
    %cst_7 = arith.constant dense<0.000000e+00> : vector<16x16xf32>
    %57 = tpu.matmul %55, %56, %cst_7 {dimension_numbers = #tpu.dot_dimension_numbers<[1], [0], [0], [1], [0, 0, 1, 1], [], []>, precision = #tpu.contract_precision<fp32>} : vector<16x128xf32>, vector<128x16xf32>, vector<16x16xf32> -> vector<16x16xf32>
    %58 = arith.addf %10, %57 : vector<16x16xf32>
    %c128_i32 = arith.constant 128 : i32
    %59 = arith.addi %8, %c128_i32 : i32
    %60 = vector.broadcast %59 : i32 to vector<16x128xi32>
    %61 = arith.addi %9, %60 : vector<16x128xi32>
    %c0_i32_8 = arith.constant 0 : i32
    %62 = vector.broadcast %c0_i32_8 : i32 to vector<16x128xi32>
    %63 = vector.extract_strided_slice %7 {offsets = [0, 0], sizes = [16, 1], strides = [1, 1]} : vector<16x8xi32> to vector<16x1xi32>
    %64 = vector.broadcast %63 : vector<16x1xi32> to vector<16x128xi32>
    %65 = arith.cmpi eq, %64, %61 : vector<16x128xi32>
    %66 = arith.extui %65 : vector<16x128xi1> to vector<16x128xi32>
    %67 = arith.addi %62, %66 : vector<16x128xi32>
    %68 = vector.extract_strided_slice %7 {offsets = [0, 1], sizes = [16, 1], strides = [1, 1]} : vector<16x8xi32> to vector<16x1xi32>
    %69 = vector.broadcast %68 : vector<16x1xi32> to vector<16x128xi32>
    %70 = arith.cmpi eq, %69, %61 : vector<16x128xi32>
    %71 = arith.extui %70 : vector<16x128xi1> to vector<16x128xi32>
    %72 = arith.addi %67, %71 : vector<16x128xi32>
    %73 = vector.extract_strided_slice %7 {offsets = [0, 2], sizes = [16, 1], strides = [1, 1]} : vector<16x8xi32> to vector<16x1xi32>
    %74 = vector.broadcast %73 : vector<16x1xi32> to vector<16x128xi32>
    %75 = arith.cmpi eq, %74, %61 : vector<16x128xi32>
    %76 = arith.extui %75 : vector<16x128xi1> to vector<16x128xi32>
    %77 = arith.addi %72, %76 : vector<16x128xi32>
    %78 = vector.extract_strided_slice %7 {offsets = [0, 3], sizes = [16, 1], strides = [1, 1]} : vector<16x8xi32> to vector<16x1xi32>
    %79 = vector.broadcast %78 : vector<16x1xi32> to vector<16x128xi32>
    %80 = arith.cmpi eq, %79, %61 : vector<16x128xi32>
    %81 = arith.extui %80 : vector<16x128xi1> to vector<16x128xi32>
    %82 = arith.addi %77, %81 : vector<16x128xi32>
    %83 = vector.extract_strided_slice %7 {offsets = [0, 4], sizes = [16, 1], strides = [1, 1]} : vector<16x8xi32> to vector<16x1xi32>
    %84 = vector.broadcast %83 : vector<16x1xi32> to vector<16x128xi32>
    %85 = arith.cmpi eq, %84, %61 : vector<16x128xi32>
    %86 = arith.extui %85 : vector<16x128xi1> to vector<16x128xi32>
    %87 = arith.addi %82, %86 : vector<16x128xi32>
    %88 = vector.extract_strided_slice %7 {offsets = [0, 5], sizes = [16, 1], strides = [1, 1]} : vector<16x8xi32> to vector<16x1xi32>
    %89 = vector.broadcast %88 : vector<16x1xi32> to vector<16x128xi32>
    %90 = arith.cmpi eq, %89, %61 : vector<16x128xi32>
    %91 = arith.extui %90 : vector<16x128xi1> to vector<16x128xi32>
    %92 = arith.addi %87, %91 : vector<16x128xi32>
    %93 = vector.extract_strided_slice %7 {offsets = [0, 6], sizes = [16, 1], strides = [1, 1]} : vector<16x8xi32> to vector<16x1xi32>
    %94 = vector.broadcast %93 : vector<16x1xi32> to vector<16x128xi32>
    %95 = arith.cmpi eq, %94, %61 : vector<16x128xi32>
    %96 = arith.extui %95 : vector<16x128xi1> to vector<16x128xi32>
    %97 = arith.addi %92, %96 : vector<16x128xi32>
    %98 = vector.extract_strided_slice %7 {offsets = [0, 7], sizes = [16, 1], strides = [1, 1]} : vector<16x8xi32> to vector<16x1xi32>
    %99 = vector.broadcast %98 : vector<16x1xi32> to vector<16x128xi32>
    %100 = arith.cmpi eq, %99, %61 : vector<16x128xi32>
    %101 = arith.extui %100 : vector<16x128xi1> to vector<16x128xi32>
    %102 = arith.addi %97, %101 : vector<16x128xi32>
    %103 = arith.sitofp %102 : vector<16x128xi32> to vector<16x128xf32>
    %c128 = arith.constant 128 : index
    %c0_9 = arith.constant 0 : index
    %104 = vector.load %arg3[%c128, %c0_9] : memref<512x16xf32, #tpu.memory_space<vmem>>, vector<128x16xf32>
    %cst_10 = arith.constant dense<0.000000e+00> : vector<16x16xf32>
    %105 = tpu.matmul %103, %104, %cst_10 {dimension_numbers = #tpu.dot_dimension_numbers<[1], [0], [0], [1], [0, 0, 1, 1], [], []>, precision = #tpu.contract_precision<fp32>} : vector<16x128xf32>, vector<128x16xf32>, vector<16x16xf32> -> vector<16x16xf32>
    %106 = arith.addf %58, %105 : vector<16x16xf32>
    %c256_i32 = arith.constant 256 : i32
    %107 = arith.addi %8, %c256_i32 : i32
    %108 = vector.broadcast %107 : i32 to vector<16x128xi32>
    %109 = arith.addi %9, %108 : vector<16x128xi32>
    %c0_i32_11 = arith.constant 0 : i32
    %110 = vector.broadcast %c0_i32_11 : i32 to vector<16x128xi32>
    %111 = vector.extract_strided_slice %7 {offsets = [0, 0], sizes = [16, 1], strides = [1, 1]} : vector<16x8xi32> to vector<16x1xi32>
    %112 = vector.broadcast %111 : vector<16x1xi32> to vector<16x128xi32>
    %113 = arith.cmpi eq, %112, %109 : vector<16x128xi32>
    %114 = arith.extui %113 : vector<16x128xi1> to vector<16x128xi32>
    %115 = arith.addi %110, %114 : vector<16x128xi32>
    %116 = vector.extract_strided_slice %7 {offsets = [0, 1], sizes = [16, 1], strides = [1, 1]} : vector<16x8xi32> to vector<16x1xi32>
    %117 = vector.broadcast %116 : vector<16x1xi32> to vector<16x128xi32>
    %118 = arith.cmpi eq, %117, %109 : vector<16x128xi32>
    %119 = arith.extui %118 : vector<16x128xi1> to vector<16x128xi32>
    %120 = arith.addi %115, %119 : vector<16x128xi32>
    %121 = vector.extract_strided_slice %7 {offsets = [0, 2], sizes = [16, 1], strides = [1, 1]} : vector<16x8xi32> to vector<16x1xi32>
    %122 = vector.broadcast %121 : vector<16x1xi32> to vector<16x128xi32>
    %123 = arith.cmpi eq, %122, %109 : vector<16x128xi32>
    %124 = arith.extui %123 : vector<16x128xi1> to vector<16x128xi32>
    %125 = arith.addi %120, %124 : vector<16x128xi32>
    %126 = vector.extract_strided_slice %7 {offsets = [0, 3], sizes = [16, 1], strides = [1, 1]} : vector<16x8xi32> to vector<16x1xi32>
    %127 = vector.broadcast %126 : vector<16x1xi32> to vector<16x128xi32>
    %128 = arith.cmpi eq, %127, %109 : vector<16x128xi32>
    %129 = arith.extui %128 : vector<16x128xi1> to vector<16x128xi32>
    %130 = arith.addi %125, %129 : vector<16x128xi32>
    %131 = vector.extract_strided_slice %7 {offsets = [0, 4], sizes = [16, 1], strides = [1, 1]} : vector<16x8xi32> to vector<16x1xi32>
    %132 = vector.broadcast %131 : vector<16x1xi32> to vector<16x128xi32>
    %133 = arith.cmpi eq, %132, %109 : vector<16x128xi32>
    %134 = arith.extui %133 : vector<16x128xi1> to vector<16x128xi32>
    %135 = arith.addi %130, %134 : vector<16x128xi32>
    %136 = vector.extract_strided_slice %7 {offsets = [0, 5], sizes = [16, 1], strides = [1, 1]} : vector<16x8xi32> to vector<16x1xi32>
    %137 = vector.broadcast %136 : vector<16x1xi32> to vector<16x128xi32>
    %138 = arith.cmpi eq, %137, %109 : vector<16x128xi32>
    %139 = arith.extui %138 : vector<16x128xi1> to vector<16x128xi32>
    %140 = arith.addi %135, %139 : vector<16x128xi32>
    %141 = vector.extract_strided_slice %7 {offsets = [0, 6], sizes = [16, 1], strides = [1, 1]} : vector<16x8xi32> to vector<16x1xi32>
    %142 = vector.broadcast %141 : vector<16x1xi32> to vector<16x128xi32>
    %143 = arith.cmpi eq, %142, %109 : vector<16x128xi32>
    %144 = arith.extui %143 : vector<16x128xi1> to vector<16x128xi32>
    %145 = arith.addi %140, %144 : vector<16x128xi32>
    %146 = vector.extract_strided_slice %7 {offsets = [0, 7], sizes = [16, 1], strides = [1, 1]} : vector<16x8xi32> to vector<16x1xi32>
    %147 = vector.broadcast %146 : vector<16x1xi32> to vector<16x128xi32>
    %148 = arith.cmpi eq, %147, %109 : vector<16x128xi32>
    %149 = arith.extui %148 : vector<16x128xi1> to vector<16x128xi32>
    %150 = arith.addi %145, %149 : vector<16x128xi32>
    %151 = arith.sitofp %150 : vector<16x128xi32> to vector<16x128xf32>
    %c256 = arith.constant 256 : index
    %c0_12 = arith.constant 0 : index
    %152 = vector.load %arg3[%c256, %c0_12] : memref<512x16xf32, #tpu.memory_space<vmem>>, vector<128x16xf32>
    %cst_13 = arith.constant dense<0.000000e+00> : vector<16x16xf32>
    %153 = tpu.matmul %151, %152, %cst_13 {dimension_numbers = #tpu.dot_dimension_numbers<[1], [0], [0], [1], [0, 0, 1, 1], [], []>, precision = #tpu.contract_precision<fp32>} : vector<16x128xf32>, vector<128x16xf32>, vector<16x16xf32> -> vector<16x16xf32>
    %154 = arith.addf %106, %153 : vector<16x16xf32>
    %c384_i32 = arith.constant 384 : i32
    %155 = arith.addi %8, %c384_i32 : i32
    %156 = vector.broadcast %155 : i32 to vector<16x128xi32>
    %157 = arith.addi %9, %156 : vector<16x128xi32>
    %c0_i32_14 = arith.constant 0 : i32
    %158 = vector.broadcast %c0_i32_14 : i32 to vector<16x128xi32>
    %159 = vector.extract_strided_slice %7 {offsets = [0, 0], sizes = [16, 1], strides = [1, 1]} : vector<16x8xi32> to vector<16x1xi32>
    %160 = vector.broadcast %159 : vector<16x1xi32> to vector<16x128xi32>
    %161 = arith.cmpi eq, %160, %157 : vector<16x128xi32>
    %162 = arith.extui %161 : vector<16x128xi1> to vector<16x128xi32>
    %163 = arith.addi %158, %162 : vector<16x128xi32>
    %164 = vector.extract_strided_slice %7 {offsets = [0, 1], sizes = [16, 1], strides = [1, 1]} : vector<16x8xi32> to vector<16x1xi32>
    %165 = vector.broadcast %164 : vector<16x1xi32> to vector<16x128xi32>
    %166 = arith.cmpi eq, %165, %157 : vector<16x128xi32>
    %167 = arith.extui %166 : vector<16x128xi1> to vector<16x128xi32>
    %168 = arith.addi %163, %167 : vector<16x128xi32>
    %169 = vector.extract_strided_slice %7 {offsets = [0, 2], sizes = [16, 1], strides = [1, 1]} : vector<16x8xi32> to vector<16x1xi32>
    %170 = vector.broadcast %169 : vector<16x1xi32> to vector<16x128xi32>
    %171 = arith.cmpi eq, %170, %157 : vector<16x128xi32>
    %172 = arith.extui %171 : vector<16x128xi1> to vector<16x128xi32>
    %173 = arith.addi %168, %172 : vector<16x128xi32>
    %174 = vector.extract_strided_slice %7 {offsets = [0, 3], sizes = [16, 1], strides = [1, 1]} : vector<16x8xi32> to vector<16x1xi32>
    %175 = vector.broadcast %174 : vector<16x1xi32> to vector<16x128xi32>
    %176 = arith.cmpi eq, %175, %157 : vector<16x128xi32>
    %177 = arith.extui %176 : vector<16x128xi1> to vector<16x128xi32>
    %178 = arith.addi %173, %177 : vector<16x128xi32>
    %179 = vector.extract_strided_slice %7 {offsets = [0, 4], sizes = [16, 1], strides = [1, 1]} : vector<16x8xi32> to vector<16x1xi32>
    %180 = vector.broadcast %179 : vector<16x1xi32> to vector<16x128xi32>
    %181 = arith.cmpi eq, %180, %157 : vector<16x128xi32>
    %182 = arith.extui %181 : vector<16x128xi1> to vector<16x128xi32>
    %183 = arith.addi %178, %182 : vector<16x128xi32>
    %184 = vector.extract_strided_slice %7 {offsets = [0, 5], sizes = [16, 1], strides = [1, 1]} : vector<16x8xi32> to vector<16x1xi32>
    %185 = vector.broadcast %184 : vector<16x1xi32> to vector<16x128xi32>
    %186 = arith.cmpi eq, %185, %157 : vector<16x128xi32>
    %187 = arith.extui %186 : vector<16x128xi1> to vector<16x128xi32>
    %188 = arith.addi %183, %187 : vector<16x128xi32>
    %189 = vector.extract_strided_slice %7 {offsets = [0, 6], sizes = [16, 1], strides = [1, 1]} : vector<16x8xi32> to vector<16x1xi32>
    %190 = vector.broadcast %189 : vector<16x1xi32> to vector<16x128xi32>
    %191 = arith.cmpi eq, %190, %157 : vector<16x128xi32>
    %192 = arith.extui %191 : vector<16x128xi1> to vector<16x128xi32>
    %193 = arith.addi %188, %192 : vector<16x128xi32>
    %194 = vector.extract_strided_slice %7 {offsets = [0, 7], sizes = [16, 1], strides = [1, 1]} : vector<16x8xi32> to vector<16x1xi32>
    %195 = vector.broadcast %194 : vector<16x1xi32> to vector<16x128xi32>
    %196 = arith.cmpi eq, %195, %157 : vector<16x128xi32>
    %197 = arith.extui %196 : vector<16x128xi1> to vector<16x128xi32>
    %198 = arith.addi %193, %197 : vector<16x128xi32>
    %199 = arith.sitofp %198 : vector<16x128xi32> to vector<16x128xf32>
    %c384 = arith.constant 384 : index
    %c0_15 = arith.constant 0 : index
    %200 = vector.load %arg3[%c384, %c0_15] : memref<512x16xf32, #tpu.memory_space<vmem>>, vector<128x16xf32>
    %cst_16 = arith.constant dense<0.000000e+00> : vector<16x16xf32>
    %201 = tpu.matmul %199, %200, %cst_16 {dimension_numbers = #tpu.dot_dimension_numbers<[1], [0], [0], [1], [0, 0, 1, 1], [], []>, precision = #tpu.contract_precision<fp32>} : vector<16x128xf32>, vector<128x16xf32>, vector<16x16xf32> -> vector<16x16xf32>
    %202 = arith.addf %154, %201 : vector<16x16xf32>
    %c0_17 = arith.constant 0 : index
    %c0_18 = arith.constant 0 : index
    %203 = vector.load %arg6[%c0_17, %c0_18] : memref<16x16xf32, #tpu.memory_space<vmem>>, vector<16x16xf32>
    %204 = arith.addf %203, %202 : vector<16x16xf32>
    %c0_19 = arith.constant 0 : index
    %c0_20 = arith.constant 0 : index
    %205 = vector.load %arg6[%c0_19, %c0_20] : memref<16x16xf32, #tpu.memory_space<vmem>>, vector<16x16xf32>
    tpu.vector_store %arg6[%c0_19, %c0_20], %204 {strides = array<i32>} : memref<16x16xf32, #tpu.memory_space<vmem>>, vector<16x16xf32>,
    %c1_i32 = arith.constant 1 : i32
    %206 = arith.cmpi eq, %arg1, %c1_i32 : i32
    %207 = arith.extui %206 : i1 to i32
    %c0_i32_21 = arith.constant 0 : i32
    %208 = arith.cmpi ne, %207, %c0_i32_21 : i32
    scf.if %208 {
      %c0_22 = arith.constant 0 : index
      %c0_23 = arith.constant 0 : index
      %209 = vector.load %arg6[%c0_22, %c0_23] : memref<16x16xf32, #tpu.memory_space<vmem>>, vector<16x16xf32>
      %c0_24 = arith.constant 0 : index
      %c0_25 = arith.constant 0 : index
      %210 = vector.load %arg4[%c0_24, %c0_25] : memref<1x16xf32, #tpu.memory_space<vmem>>, vector<1x16xf32>
      %211 = vector.broadcast %210 : vector<1x16xf32> to vector<16x16xf32>
      %212 = arith.addf %209, %211 : vector<16x16xf32>
      %c0_26 = arith.constant 0 : index
      %c0_27 = arith.constant 0 : index
      %213 = vector.load %arg5[%c0_26, %c0_27] : memref<16x16xf32, #tpu.memory_space<vmem>>, vector<16x16xf32>
      tpu.vector_store %arg5[%c0_26, %c0_27], %212 {strides = array<i32>} : memref<16x16xf32, #tpu.memory_space<vmem>>, vector<16x16xf32>,
    } else {
    }
    return
  }
  func.func @transform_0(%arg0: i32, %arg1: i32) -> (i32, i32) {
    %c0_i32 = arith.constant 0 : i32
    %c0_i32_0 = arith.constant 0 : i32
    return %arg0, %c0_i32 : i32, i32
  }
  func.func @transform_1(%arg0: i32, %arg1: i32) -> (i32, i32) {
    %c0_i32 = arith.constant 0 : i32
    %c0_i32_0 = arith.constant 0 : i32
    return %arg1, %c0_i32 : i32, i32
  }
  func.func @transform_2(%arg0: i32, %arg1: i32) -> (i32, i32) {
    %c0_i32 = arith.constant 0 : i32
    %c0_i32_0 = arith.constant 0 : i32
    %c0_i32_1 = arith.constant 0 : i32
    return %c0_i32, %c0_i32_0 : i32, i32
  }
  func.func @transform_3(%arg0: i32, %arg1: i32) -> (i32, i32) {
    %c0_i32 = arith.constant 0 : i32
    %c0_i32_0 = arith.constant 0 : i32
    return %arg0, %c0_i32 : i32, i32
  }
}

</mosaic_0001>

<bundles_post_ra>
// kernel: tpu_custom_call.1
= control target key start
LH: loop header
LB: loop body
LE: loop exit
PB: predicated region body
PF: predicated region fallthrough
CT: control target
= control target key end

     0   :  { %s5622_s12 = smov 0   ;;  %s5624_s13 = smov 0   ;;  %s7544_s0 = inlined_call_operand.vmem [shape: s32[32,8], index: 0, kind: input, shape index: {}]   ;;  %s7545_s1 = inlined_call_operand.vmem [shape: f32[1024,16], index: 1, kind: input, shape index: {}]   ;;  %s7546_s2 = inlined_call_operand.vmem [shape: f32[1,16], index: 2, kind: input, shape index: {}]   ;;  %s7547_s3 = inlined_call_operand.vmem [shape: f32[32,16], index: 3, kind: output, shape index: {}]  }
   0x1   :  { %s5626_s14 = smov 0   ;;  %s5628_s15 = smov 0  }
   0x2   :  { %s5630_s16 = smov 0  }
   0x3 LB: > { %s22_s17 = sadd.s32 1, %s5583_s14  ;;  %s25_s18 = sadd.s32 1, %s5587_s15  ;;  %s5591_s16 = sphi %s5630_s16, %s13_s16   ;;  %s5587_s15 = sphi %s5628_s15, %s8012_s15   ;;  %s5583_s14 = sphi %s5626_s14, %s8011_s14   ;;  %s5579_s13 = sphi %s5624_s13, %s8010_s13   ;;  %s5575_s12 = sphi %s5622_s12, %s8009_s12  }
   0x4   : > { %p23_p0 = scmp.ge.s32.totalorder %s22_s17, 2  ;;  %p3391_p1 = scmp.ge.s32.totalorder %s5591_s16, 1 }
   0x5   : > { %p161_p2 = scmp.lt.s32.totalorder %s5591_s16, 5 }
   0x6   : > { %s8014_s17 = smov (%p23_p0, %s22_s17), 0  ;;  %s8016_s18 = smov (!%p23_p0, %s25_s18), %s5587_s15 }
   0x7   : > { %p162_p3 = pnand %p3391_p1, %p161_p2  ;;  %p27_p4 = scmp.ge.s32.totalorder %s8016_s18, 2 }
   0x9   : > { %s8018_s18 = smov (%p27_p4, %s8016_s18), 0  ;;  %165 = sbr.rel (%p162_p3) target bundleno = 807 (0x327), region = 32 }
  0x10   : > { %s3392_s19 = sshll.u32 %s5579_s13, 1  ;;  %s3394_s20 = sshll.u32 %s5575_s12, 6 }
  0x11   : > { %p191_p5 = scmp.lt.s32.totalorder %s3392_s19, 3  ;;  %p197_p6 = scmp.lt.s32.totalorder %s3394_s20, 127 }
  0x12   : > { %p3398_p7 = scmp.ne.s32.totalorder %s5575_s12, 0 }
  0x13   : > { %s8020_s19 = smov (!%p191_p5, %s3392_s19), 3  ;;  %s8022_s20 = smov (!%p197_p6, %s3394_s20), 127 }
  0x14   : > { %s3393_s21 = sshll.u32 %s8020_s19, 3  ;;  %s3395_s25 = sshll.u32 %s8022_s20, 3  ;;  %vm212_vm0 = vcmask (!%p3398_p7), 130048   ;;  %v5593_v0 = vmov (!%p3398_p7), 0.0  }
  0x15   : > { %s194_s24 = scalar_lea.vmem %s7544_s0, %s3393_s21  ;;  %s5661_s28 = scalar_lea.vmem %s7545_s1, %s3395_s25  ;;  %213 = vst.msk [vmem:[#allocation2] sm:$0xff] (!%p3398_p7), %vm212_vm0, %v5593_v0  ;;  %214 = vst.msk [vmem:[#allocation2 + $0x8] sm:$0xff] (!%p3398_p7), %vm212_vm0, %v5593_v0 }
  0x16   : > { %s5666_s4 = scalar_lea.vmem %s7547_s3, %s3393_s21  ;;  %211 = sbr.rel (%p3398_p7) target bundleno = 29 (0x1d), region = 36 }
  0x1d PF: > { %v216_v1 = vld [vmem:[%s194_s24 + $0x8] sm:$0xff]  ;;  %v215_v2 = vld [vmem:[%s194_s24] sm:$0xff]  ;;  %v7548_v3 = vmov 0   ;;  %s5672_s5 = sshll.u32 %s5575_s12, 9  ;;  %v226_v6 = vlaneseq  ;;  %v5595_v14 = vmov 1   ;;  %v5596_v15 = vmov 2  }
  0x1e   : > { %5541 = vset.pattern.permute.xlu1 %v7548_v3  ;;  %5539 = vset.pattern.permute.xlu0 %v7548_v3  ;;  %vm219_vm1 = vcmp.gt.s32.totalorder %v216_v1, 0  ;;  %vm217_vm2 = vcmp.gt.s32.totalorder %v215_v2, 0  ;;  %s2530_s6 = sadd.s32 384, %s5672_s5  ;;  %v228_v9 = vstv %s5672_s5  ;;  %v5597_v16 = vmov 3   ;;  %v5702_v20 = vld [vmem:[%s5661_s28 + $0x80] sm:$0xff]  ;;  %v5705_v21 = vld [vmem:[%s5661_s28 + $0x88] sm:$0xff] }
  0x1f   : > { %v220_v4 = vsel %vm219_vm1, %v216_v1, 0  ;;  %v218_v5 = vsel %vm217_vm2, %v215_v2, 0  ;;  %v5682_v10 = vand.u32 127, %v226_v6  ;;  %v2531_v11 = vstv %s2530_s6  ;;  %v5708_v22 = vld [vmem:[%s5661_s28 + $0x100] sm:$0xff]  ;;  %v5713_v25 = vld [vmem:[%s5661_s28 + $0x108] sm:$0xff]  ;;  %v5731_v30 = vld [vmem:[%s5661_s28 + $0x90] sm:$0xff] }
  0x20   : > { %vm223_vm3 = vcmp.lt.s32.totalorder %v220_v4, 699  ;;  %vm221_vm4 = vcmp.lt.s32.totalorder %v218_v5, 699  ;;  %v5598_v17 = vmov 4   ;;  %v5599_v18 = vmov 5   ;;  %v5734_v31 = vld [vmem:[%s5661_s28 + $0x98] sm:$0xff]  ;;  %v5737_v32 = vld [vmem:[%s5661_s28 + $0x110] sm:$0xff] }
  0x21   : > { %v5675_v7 = vsel %vm223_vm3, %v220_v4, 699  ;;  %v5677_v8 = vsel %vm221_vm4, %v218_v5, 699  ;;  %v5685_v12 = vadd.s32 %v228_v9, %v5682_v10  ;;  %v5688_v13 = vadd.s32 %v2531_v11, %v5682_v10  ;;  %v5743_v35 = vld [vmem:[%s5661_s28 + $0x118] sm:$0xff]  ;;  %v5763_v41 = vld [vmem:[%s5661_s28 + $0xa0] sm:$0xff]  ;;  %v5766_v42 = vld [vmem:[%s5661_s28 + $0xa8] sm:$0xff]  ;;  %s342_s7 = sadd.s32 128, %s5672_s5 }
  0x22   : > { %234 = vperm.xlu1 %5541, %v5675_v7   ;;  %231 = vperm.xlu0 %5539, %v5677_v8   ;;  %v5600_v19 = vmov 7   ;;  %v410_v23 = vand.u32 4294901760, %v5702_v20  ;;  %v413_v24 = vand.u32 4294901760, %v5705_v21  ;;  %v1845_v26 = vand.u32 4294901760, %v5708_v22  ;;  %v5769_v43 = vld [vmem:[%s5661_s28 + $0x120] sm:$0xff]  ;;  %v5776_v46 = vld [vmem:[%s5661_s28 + $0x128] sm:$0xff] }
  0x23   : > { %v1848_v27 = vand.u32 4294901760, %v5713_v25  ;;  %v416_v33 = vand.u32 4294901760, %v5731_v30  ;;  %v419_v34 = vand.u32 4294901760, %v5734_v31  ;;  %v1851_v36 = vand.u32 4294901760, %v5737_v32  ;;  %v5796_v51 = vld [vmem:[%s5661_s28 + $0xb0] sm:$0xff]  ;;  %v5799_v52 = vld [vmem:[%s5661_s28 + $0xb8] sm:$0xff] }
  0x24   : > { %v5721_v28 = vpack.c.bf16 %v413_v24, %v410_v23  ;;  %v7570_v37 = vand.u32 4294901760, %v5743_v35  ;;  %v5601_v39 = vmov 6   ;;  %v7569_v44 = vand.u32 4294901760, %v5763_v41  ;;  %v5802_v53 = vld [vmem:[%s5661_s28 + $0x130] sm:$0xff]  ;;  %v5809_v56 = vld [vmem:[%s5661_s28 + $0x138] sm:$0xff]  ;;  %v5829_v61 = vld [vmem:[%s5661_s28 + $0xc0] sm:$0xff] }
  0x25   : > { %v5728_v29 = vpack.c.bf16 %v1848_v27, %v1845_v26  ;;  %v5754_v38 = vpack.c.bf16 %v419_v34, %v416_v33  ;;  %v7568_v45 = vand.u32 4294901760, %v5766_v42  ;;  %v7567_v47 = vand.u32 4294901760, %v5769_v43  ;;  %v5832_v62 = vld [vmem:[%s5661_s28 + $0xc8] sm:$0xff]  ;;  %v5835_v63 = vld [vmem:[%s5661_s28 + $0x140] sm:$0xff]  ;;  %v5870_v9 = vld [vmem:[%s5661_s28 + $0xd8] sm:$0xff]  ;;  %s1777_s8 = sadd.s32 256, %s5672_s5 }
  0x26   : > { %5542 = vset.pattern.permute.xlu1 %v5595_v14  ;;  %5540 = vset.pattern.permute.xlu0 %v5595_v14  ;;  %7730 = vst [vmem:[#allocation3_spill] sm:$0xff] %v5721_v28  ;;  %v5760_v40 = vpack.c.bf16 %v7570_v37, %v1851_v36  ;;  %v7566_v48 = vand.u32 4294901760, %v5776_v46  ;;  %v7565_v54 = vand.u32 4294901760, %v5796_v51  ;;  %v7560_v55 = vand.u32 4294901760, %v5799_v52  ;;  %v5842_v2 = vld [vmem:[%s5661_s28 + $0x148] sm:$0xff]  ;;  %v5873_v11 = vld [vmem:[%s5661_s28 + $0x150] sm:$0xff] }
  0x27   : > { %244 = vperm.xlu1 %5542, %v5675_v7   ;;  %241 = vperm.xlu0 %5540, %v5677_v8   ;;  %7731 = vst [vmem:[#allocation4_spill] sm:$0xff] %v5728_v29  ;;  %7732 = vst [vmem:[#allocation5_spill] sm:$0xff] %v5754_v38  ;;  %v5787_v49 = vpack.c.bf16 %v7568_v45, %v7569_v44  ;;  %v7559_v57 = vand.u32 4294901760, %v5802_v53  ;;  %v7558_v58 = vand.u32 4294901760, %v5809_v56  ;;  %v7557_v0 = vand.u32 4294901760, %v5829_v61  ;;  %v5895_v3 = vld [vmem:[%s5661_s28 + $0xe0] sm:$0xff] }
  0x28   : > { %4677 = vmatprep.subr.bf16.mxu1 %v5721_v28  ;;  %5061 = vmatprep.subr.bf16.mxu0 %v5728_v29  ;;  %7733 = vst [vmem:[#allocation6_spill] sm:$0xff] %v5760_v40  ;;  %v5793_v50 = vpack.c.bf16 %v7566_v48, %v7567_v47  ;;  %v5820_v59 = vpack.c.bf16 %v7560_v55, %v7565_v54  ;;  %v7554_v1 = vand.u32 4294901760, %v5832_v62  ;;  %v7551_v4 = vand.u32 4294901760, %v5835_v63  ;;  %p3400_p8 = scmp.ne.s32.totalorder %s5575_s12, 1 }
  0x29   : > { %4679 = vmatpush3.bf16.msra.mxu1 %v5721_v28  ;;  %5063 = vmatpush3.bf16.msra.mxu0 %v5728_v29  ;;  %7734 = vst [vmem:[#allocation7_spill] sm:$0xff] %v5787_v49  ;;  %v5826_v60 = vpack.c.bf16 %v7558_v58, %v7559_v57  ;;  %v7550_v5 = vand.u32 4294901760, %v5842_v2  ;;  %v5923_v58 = vsub.f32 %v5702_v20, %v410_v23  ;;  %v5945_v20 = vld [vmem:[%s5661_s28 + $0xf8] sm:$0xff]  ;;  %v5948_v23 = vld [vmem:[%s5661_s28 + $0x170] sm:$0xff] }
  0x2a   : > { %4681 = vmatprep.subr.bf16.mxu1 %v5754_v38  ;;  %5065 = vmatprep.subr.bf16.mxu0 %v5760_v40  ;;  %7735 = vst [vmem:[#allocation8_spill] sm:$0xff] %v5793_v50  ;;  %7736 = vst [vmem:[#allocation9_spill] sm:$0xff] %v5820_v59  ;;  %v5854_v6 = vpack.c.bf16 %v7554_v1, %v7557_v0  ;;  %v5907_v1 = vld [vmem:[%s5661_s28 + $0x168] sm:$0xff]  ;;  %v5928_v57 = vsub.f32 %v5705_v21, %v413_v24  ;;  %v7571_v24 = vand.u32 4294901760, %v5945_v20 }
  0x2b   : > { %5543 = vset.pattern.permute.xlu1 %v5596_v15  ;;  %5544 = vset.pattern.permute.xlu0 %v5596_v15  ;;  %7737 = vst [vmem:[#allocation10_spill] sm:$0xff] %v5826_v60  ;;  %v7552_v15 = vand.u32 4294901760, %v5870_v9  ;;  %v5933_v55 = vsub.f32 %v5708_v22, %v1845_v26  ;;  %v5953_v21 = vsub.f32 %v5713_v25, %v1848_v27  ;;  %v5959_v26 = vld [vmem:[%s5661_s28 + $0x178] sm:$0xff] }
  0x2c   : > { %253 = vperm.xlu1 %5543, %v5677_v8   ;;  %256 = vperm.xlu0 %5544, %v5675_v7   ;;  %7738 = vst [vmem:[#allocation11_spill] sm:$0xff] %v5854_v6  ;;  %v7573_v54 = vand.u32 4294901760, %v5959_v26  ;;  %v7576_v25 = vand.u32 4294901760, %v5928_v57  ;;  %v5982_v44 = vsub.f32 %v5731_v30, %v416_v33  ;;  %v5987_v37 = vsub.f32 %v5734_v31, %v419_v34 }
  0x2d   : > { %4683 = vmatpush3.bf16.msra.mxu1 %v5754_v38  ;;  %5067 = vmatpush3.bf16.msra.mxu0 %v5760_v40  ;;  %7743 = vst [vmem:[#allocation16_spill] sm:$0xff] %v5933_v55  ;;  %7745 = vst [vmem:[#allocation18_spill] sm:$0xff] %v5953_v21  ;;  %v7575_v27 = vand.u32 4294901760, %v5933_v55  ;;  %v7578_v48 = vand.u32 4294901760, %v5953_v21 }
  0x2e   : > { %4685 = vmatprep.subr.bf16.mxu1 %v5787_v49  ;;  %5069 = vmatprep.subr.bf16.mxu0 %v5793_v50  ;;  %7747 = vst [vmem:[#allocation20_spill] sm:$0xff] %v5982_v44  ;;  %7748 = vst [vmem:[#allocation21_spill] sm:$0xff] %v5987_v37  ;;  %v7583_v34 = vand.u32 4294901760, %v5982_v44 }
  0x2f   : > { %v1949_v30 = vsub.f32 %v5933_v55, %v7575_v27  ;;  %v1956_v33 = vsub.f32 %v5953_v21, %v7578_v48  ;;  %v7751_v48 = vand.u32 4294901760, %v5743_v35 }
  0x30   : > { %5545 = vset.pattern.permute.xlu1 %v5597_v16  ;;  %5546 = vset.pattern.permute.xlu0 %v5598_v17  ;;  %v5878_v16 = vld [vmem:[%s5661_s28 + $0x158] sm:$0xff] }
  0x31   : > { %265 = vperm.xlu1 %5545, %v5677_v8   ;;  %277 = vperm.xlu0 %5546, %v5677_v8  }
  0x32   : > { %4687 = vmatpush3.bf16.msra.mxu1 %v5787_v49  ;;  %5071 = vmatpush3.bf16.msra.mxu0 %v5793_v50 }
  0x33   : > { %4689 = vmatprep.subr.bf16.mxu1 %v5820_v59  ;;  %5073 = vmatprep.subr.bf16.mxu0 %v5826_v60 }
  0x35   : > { %268 = vperm.xlu1 %5545, %v5675_v7   ;;  %5549 = vset.pattern.permute.xlu0 %v5599_v18 }
  0x36   : > { %292 = vperm.xlu0 %5549, %v5675_v7   ;;  %4691 = vmatpush3.bf16.msra.mxu1 %v5820_v59 }
  0x37   : > { %5075 = vmatpush3.bf16.msra.mxu0 %v5826_v60  ;;  %4693 = vmatprep.subr.bf16.mxu1 %v5854_v6 }
  0x39   : > { %5547 = vset.pattern.permute.xlu1 %v5598_v17  ;;  %v7556_v17 = vand.u32 4294901760, %v5873_v11 }
  0x3a   : > { %280 = vperm.xlu1 %5547, %v5675_v7   ;;  %5551 = vset.pattern.permute.xlu0 %v5600_v19 }
  0x3b   : > { %313 = vperm.xlu0 %5551, %v5677_v8   ;;  %4695 = vmatpush3.bf16.msra.mxu1 %v5854_v6 }
  0x3e   : > { %5548 = vset.pattern.permute.xlu1 %v5599_v18  ;;  %v7555_v18 = vand.u32 4294901760, %v5878_v16 }
  0x3f   : > { %289 = vperm.xlu1 %5548, %v5677_v8  }
  0x43   : > { %5550 = vset.pattern.permute.xlu1 %v5601_v39  ;;  %v5892_v39 = vpack.c.bf16 %v7555_v18, %v7556_v17  ;;  %v7563_v17 = vand.u32 4294901760, %v5907_v1 }
  0x44   : > { %301 = vperm.xlu1 %5550, %v5677_v8   ;;  %v5867_v8 = vld [vmem:[%s5661_s28 + $0xd0] sm:$0xff] }
  0x45   : > { %v7553_v14 = vand.u32 4294901760, %v5867_v8  ;;  %7741 = vst [vmem:[#allocation14_spill] sm:$0xff] %v5892_v39 }
  0x48   : > { %304 = vperm.xlu1 %5550, %v5675_v7  }
  0x4c   : > { %5552 = vset.pattern.permute.xlu1 %v5600_v19  ;;  %v5886_v19 = vpack.c.bf16 %v7552_v15, %v7553_v14  ;;  %v7562_v15 = vand.u32 4294901760, %v5895_v3 }
  0x4d   : > { %316 = vperm.xlu1 %5552, %v5675_v7   ;;  %v5860_v7 = vpack.c.bf16 %v7550_v5, %v7551_v4  ;;  %v5898_v5 = vld [vmem:[%s5661_s28 + $0xe8] sm:$0xff]  ;;  %v5901_v4 = vld [vmem:[%s5661_s28 + $0x160] sm:$0xff] }
  0x4e   : > { %7740 = vst [vmem:[#allocation13_spill] sm:$0xff] %v5886_v19  ;;  %4697 = vmatprep.subr.bf16.mxu1 %v5886_v19  ;;  %v7561_v14 = vand.u32 4294901760, %v5898_v5  ;;  %v7564_v18 = vand.u32 4294901760, %v5901_v4 }
  0x4f   : > { %7739 = vst [vmem:[#allocation12_spill] sm:$0xff] %v5860_v7  ;;  %5077 = vmatprep.subr.bf16.mxu0 %v5860_v7  ;;  %4699 = vmatpush3.bf16.msra.mxu1 %v5886_v19  ;;  %v7773_v19 = vand.u32 4294901760, %v5829_v61 }
  0x50   : > { %5079 = vmatpush3.bf16.msra.mxu0 %v5860_v7  ;;  %v5918_v0 = vpack.c.bf16 %v7561_v14, %v7562_v15  ;;  %v5939_v14 = vpack.c.bf16 %v7563_v17, %v7564_v18  ;;  %v5942_v15 = vld [vmem:[%s5661_s28 + $0xf0] sm:$0xff]  ;;  %v7574_v17 = vand.u32 4294901760, %v5948_v23  ;;  %v7572_v18 = vand.u32 4294901760, %v5923_v58 }
  0x51   : > { %5081 = vmatprep.subr.bf16.mxu0 %v5892_v39  ;;  %v7577_v22 = vand.u32 4294901760, %v5942_v15 }
  0x52   : > { %7742 = vst [vmem:[#allocation15_spill] sm:$0xff] %v5918_v0  ;;  %7744 = vst [vmem:[#allocation17_spill] sm:$0xff] %v5939_v14  ;;  %4701 = vmatprep.subr.bf16.mxu1 %v5918_v0  ;;  %v514_v45 = vsub.f32 %v5923_v58, %v7572_v18  ;;  %v521_v18 = vsub.f32 %v5928_v57, %v7576_v25  ;;  %v1950_v25 = vand.u32 4294901760, %v1949_v30 }
  0x53   : > { %4703 = vmatpush3.bf16.msra.mxu1 %v5918_v0  ;;  %v5974_v47 = vpack.c.bf16 %v7571_v24, %v7577_v22  ;;  %v5993_v24 = vpack.c.bf16 %v7573_v54, %v7574_v17  ;;  %v6010_v17 = vsub.f32 %v5737_v32, %v1851_v36  ;;  %v1957_v22 = vand.u32 4294901760, %v1956_v33 }
  0x54   : > { %5083 = vmatpush3.bf16.msra.mxu0 %v5892_v39  ;;  %v515_v31 = vand.u32 4294901760, %v514_v45  ;;  %v522_v27 = vand.u32 4294901760, %v521_v18  ;;  %v6017_v45 = vsub.f32 %v5743_v35, %v7751_v48  ;;  %v528_v54 = vsub.f32 %v5982_v44, %v7583_v34 }
  0x55   : > { %5085 = vmatprep.subr.bf16.mxu0 %v5939_v14  ;;  %7746 = vst [vmem:[#allocation19_spill] sm:$0xff] %v5974_v47  ;;  %7749 = vst [vmem:[#allocation22_spill] sm:$0xff] %v5993_v24  ;;  %4705 = vmatprep.subr.bf16.mxu1 %v5974_v47  ;;  %v7753_v32 = vand.u32 4294901760, %v5987_v37  ;;  %v7754_v18 = vand.u32 4294901760, %v5763_v41  ;;  %v6034_v35 = vpack.c.bf16 %v1957_v22, %v1950_v25 }
  0x56   : > { %7750 = vst [vmem:[#allocation23_spill] sm:$0xff] %v6010_v17  ;;  %7752 = vst [vmem:[#allocation24_spill] sm:$0xff] %v6017_v45  ;;  %v6032_v33 = vpack.c.bf16 %v522_v27, %v515_v31  ;;  %v7588_v48 = vand.u32 4294901760, %v6017_v45 }
  0x57   : > { %4707 = vmatpush3.bf16.msra.mxu1 %v5974_v47  ;;  %v535_v36 = vsub.f32 %v5987_v37, %v7753_v32  ;;  %v7589_v47 = vand.u32 4294901760, %v6010_v17  ;;  %v6030_v30 = vsub.f32 %v5763_v41, %v7754_v18 }
  0x58   : > { %5087 = vmatpush3.bf16.msra.mxu0 %v5939_v14  ;;  %v529_v14 = vand.u32 4294901760, %v528_v54  ;;  %4709 = vmatprep.subr.bf16.mxu1 %v6032_v33  ;;  %v1970_v22 = vsub.f32 %v6017_v45, %v7588_v48  ;;  %v7762_v48 = vand.u32 4294901760, %v5796_v51 }
  0x59   : > { %5089 = vmatprep.subr.bf16.mxu0 %v5993_v24  ;;  %7755 = vst [vmem:[#allocation25_spill] sm:$0xff] %v6030_v30  ;;  %v536_v32 = vand.u32 4294901760, %v535_v36  ;;  %v1963_v0 = vsub.f32 %v6010_v17, %v7589_v47  ;;  %v7590_v41 = vand.u32 4294901760, %v6030_v30 }
  0x5a   : > { %v6070_v47 = vsub.f32 %v5796_v51, %v7762_v48  ;;  %v1971_v25 = vand.u32 4294901760, %v1970_v22  ;;  %v7767_v51 = vand.u32 4294901760, %v5802_v53 }
  0x5b   : > { %v6062_v31 = vpack.c.bf16 %v536_v32, %v529_v14  ;;  %v1964_v36 = vand.u32 4294901760, %v1963_v0  ;;  %v542_v18 = vsub.f32 %v6030_v30, %v7590_v41 }
  0x5c   : > { %5091 = vmatpush3.bf16.msra.mxu0 %v5993_v24  ;;  %v7756_v24 = vand.u32 4294901760, %v5766_v42  ;;  %7763 = vst [vmem:[#allocation29_spill] sm:$0xff] %v6070_v47  ;;  %v6086_v48 = vsub.f32 %v5802_v53, %v7767_v51  ;;  %v7770_v39 = vand.u32 4294901760, %v6070_v47 }
  0x5d   : > { %5093 = vmatprep.subr.bf16.mxu0 %v6034_v35  ;;  %v543_v32 = vand.u32 4294901760, %v542_v18  ;;  %v6088_v22 = vpack.c.bf16 %v1971_v25, %v1964_v36  ;;  %v7771_v25 = vand.u32 4294901760, %v5809_v56 }
  0x5e   : > { %v6040_v34 = vsub.f32 %v5766_v42, %v7756_v24  ;;  %v7758_v42 = vand.u32 4294901760, %v5769_v43  ;;  %v7760_v24 = vand.u32 4294901760, %v5776_v46  ;;  %7768 = vst [vmem:[#allocation31_spill] sm:$0xff] %v6086_v48  ;;  %v7600_v53 = vand.u32 4294901760, %v6086_v48 }
  0x5f   : > { %v6104_v36 = vsub.f32 %v5809_v56, %v7771_v25 }
  0x60   : > { %7757 = vst [vmem:[#allocation26_spill] sm:$0xff] %v6040_v34  ;;  %v6055_v54 = vsub.f32 %v5769_v43, %v7758_v42  ;;  %v6060_v27 = vsub.f32 %v5776_v46, %v7760_v24  ;;  %v7764_v43 = vand.u32 4294901760, %v6040_v34  ;;  %v7765_v24 = vand.u32 4294901760, %v5799_v52 }
  0x61   : > { %7772 = vst [vmem:[#allocation32_spill] sm:$0xff] %v6104_v36  ;;  %v1991_v6 = vsub.f32 %v6086_v48, %v7600_v53  ;;  %v7601_v56 = vand.u32 4294901760, %v6104_v36 }
  0x62   : > { %7759 = vst [vmem:[#allocation27_spill] sm:$0xff] %v6055_v54  ;;  %7761 = vst [vmem:[#allocation28_spill] sm:$0xff] %v6060_v27  ;;  %v549_v42 = vsub.f32 %v6040_v34, %v7764_v43  ;;  %v7593_v46 = vand.u32 4294901760, %v6055_v54  ;;  %v6081_v41 = vsub.f32 %v5799_v52, %v7765_v24  ;;  %v7769_v18 = vand.u32 4294901760, %v6060_v27 }
  0x63   : > { %v556_v52 = vsub.f32 %v6070_v47, %v7770_v39  ;;  %v1992_v25 = vand.u32 4294901760, %v1991_v6  ;;  %v1998_v53 = vsub.f32 %v6104_v36, %v7601_v56 }
  0x64   : > { %7766 = vst [vmem:[#allocation30_spill] sm:$0xff] %v6081_v41  ;;  %v550_v43 = vand.u32 4294901760, %v549_v42  ;;  %v1977_v14 = vsub.f32 %v6055_v54, %v7593_v46  ;;  %v1984_v0 = vsub.f32 %v6060_v27, %v7769_v18  ;;  %v7602_v24 = vand.u32 4294901760, %v6081_v41 }
  0x65   : > { %v6111_v18 = vsub.f32 %v5829_v61, %v7773_v19  ;;  %v557_v7 = vand.u32 4294901760, %v556_v52  ;;  %v7777_v19 = vand.u32 4294901760, %v5835_v63  ;;  %v1999_v56 = vand.u32 4294901760, %v1998_v53 }
  0x66   : > { %v6106_v42 = vpack.c.bf16 %v550_v43, %v543_v32  ;;  %v1978_v51 = vand.u32 4294901760, %v1977_v14  ;;  %v1985_v46 = vand.u32 4294901760, %v1984_v0  ;;  %v563_v39 = vsub.f32 %v6081_v41, %v7602_v24 }
  0x67   : > { %7774 = vst [vmem:[#allocation33_spill] sm:$0xff] %v6111_v18  ;;  %v7603_v14 = vand.u32 4294901760, %v6111_v18  ;;  %v7775_v0 = vand.u32 4294901760, %v5832_v62  ;;  %v6131_v43 = vsub.f32 %v5835_v63, %v7777_v19 }
  0x68   : > { %v6120_v32 = vpack.c.bf16 %v1985_v46, %v1978_v51  ;;  %v564_v52 = vand.u32 4294901760, %v563_v39  ;;  %v7779_v46 = vand.u32 4294901760, %v5842_v2  ;;  %v7781_v39 = vand.u32 4294901760, %v5867_v8 }
  0x69   : > { %v6126_v61 = vsub.f32 %v5832_v62, %v7775_v0  ;;  %7778 = vst [vmem:[#allocation35_spill] sm:$0xff] %v6131_v43  ;;  %v570_v62 = vsub.f32 %v6111_v18, %v7603_v14  ;;  %v7785_v60 = vand.u32 4294901760, %v6131_v43 }
  0x6a   : > { %v6139_v51 = vsub.f32 %v5842_v2, %v7779_v46  ;;  %v6149_v6 = vsub.f32 %v5867_v8, %v7781_v39  ;;  %v6151_v19 = vpack.c.bf16 %v564_v52, %v557_v7  ;;  %v7783_v2 = vand.u32 4294901760, %v5870_v9 }
  0x6b   : > { %7776 = vst [vmem:[#allocation34_spill] sm:$0xff] %v6126_v61  ;;  %v7606_v0 = vand.u32 4294901760, %v6126_v61  ;;  %v571_v14 = vand.u32 4294901760, %v570_v62  ;;  %v2005_v8 = vsub.f32 %v6131_v43, %v7785_v60  ;;  %v6166_v52 = vpack.c.bf16 %v1999_v56, %v1992_v25 }
  0x6c   : > { %7780 = vst [vmem:[#allocation36_spill] sm:$0xff] %v6139_v51  ;;  %7782 = vst [vmem:[#allocation37_spill] sm:$0xff] %v6149_v6  ;;  %v7609_v24 = vand.u32 4294901760, %v6139_v51  ;;  %v6157_v46 = vsub.f32 %v5870_v9, %v7783_v2  ;;  %v7612_v7 = vand.u32 4294901760, %v6149_v6  ;;  %v7786_v62 = vand.u32 4294901760, %v5873_v11 }
  0x6d   : > { %v577_v63 = vsub.f32 %v6126_v61, %v7606_v0  ;;  %v2006_v0 = vand.u32 4294901760, %v2005_v8  ;;  %v7788_v56 = vand.u32 4294901760, %v5878_v16 }
  0x6e   : > { %7784 = vst [vmem:[#allocation38_spill] sm:$0xff] %v6157_v46  ;;  %v2012_v53 = vsub.f32 %v6139_v51, %v7609_v24  ;;  %v7613_v9 = vand.u32 4294901760, %v6157_v46  ;;  %v6175_v39 = vsub.f32 %v5873_v11, %v7786_v62  ;;  %v584_v60 = vsub.f32 %v6149_v6, %v7612_v7 }
  0x6f   : > { %v578_v2 = vand.u32 4294901760, %v577_v63  ;;  %v6183_v25 = vsub.f32 %v5878_v16, %v7788_v56  ;;  %v7790_v11 = vand.u32 4294901760, %v5895_v3  ;;  %v7792_v16 = vand.u32 4294901760, %v5898_v5 }
  0x70   : > { %7787 = vst [vmem:[#allocation39_spill] sm:$0xff] %v6175_v39  ;;  %v2013_v59 = vand.u32 4294901760, %v2012_v53  ;;  %v591_v24 = vsub.f32 %v6157_v46, %v7613_v9  ;;  %v7617_v50 = vand.u32 4294901760, %v6175_v39  ;;  %v585_v62 = vand.u32 4294901760, %v584_v60 }
  0x71   : > { %7789 = vst [vmem:[#allocation40_spill] sm:$0xff] %v6183_v25  ;;  %v6192_v63 = vsub.f32 %v5895_v3, %v7790_v11  ;;  %v6194_v8 = vpack.c.bf16 %v578_v2, %v571_v14  ;;  %v7616_v7 = vand.u32 4294901760, %v6183_v25  ;;  %v6200_v53 = vsub.f32 %v5898_v5, %v7792_v16 }
  0x72   : > { %v6202_v56 = vpack.c.bf16 %v2013_v59, %v2006_v0  ;;  %v592_v9 = vand.u32 4294901760, %v591_v24  ;;  %v2019_v49 = vsub.f32 %v6175_v39, %v7617_v50  ;;  %v7794_v60 = vand.u32 4294901760, %v5901_v4 }
  0x73   : > { %7791 = vst [vmem:[#allocation41_spill] sm:$0xff] %v6192_v63  ;;  %7793 = vst [vmem:[#allocation42_spill] sm:$0xff] %v6200_v53  ;;  %v7618_v3 = vand.u32 4294901760, %v6192_v63  ;;  %v2026_v14 = vsub.f32 %v6183_v25, %v7616_v7  ;;  %v7796_v59 = vand.u32 4294901760, %v5907_v1  ;;  %v7798_v7 = vand.u32 4294901760, %v5942_v15 }
  0x74   : > { %v6215_v5 = vsub.f32 %v5901_v4, %v7794_v60  ;;  %v6222_v0 = vpack.c.bf16 %v592_v9, %v585_v62  ;;  %v2020_v11 = vand.u32 4294901760, %v2019_v49  ;;  %v7800_v4 = vand.u32 4294901760, %v6200_v53 }
  0x75   : > { %v6220_v24 = vsub.f32 %v5907_v1, %v7796_v59  ;;  %v598_v16 = vsub.f32 %v6192_v63, %v7618_v3  ;;  %v6230_v50 = vsub.f32 %v5942_v15, %v7798_v7  ;;  %v2027_v2 = vand.u32 4294901760, %v2026_v14 }
  0x76   : > { %7795 = vst [vmem:[#allocation43_spill] sm:$0xff] %v6215_v5  ;;  %v605_v60 = vsub.f32 %v6200_v53, %v7800_v4  ;;  %v7621_v1 = vand.u32 4294901760, %v6215_v5  ;;  %v7801_v59 = vand.u32 4294901760, %v5945_v20  ;;  %v7803_v15 = vand.u32 4294901760, %v5948_v23 }
  0x77   : > { %7797 = vst [vmem:[#allocation44_spill] sm:$0xff] %v6220_v24  ;;  %7799 = vst [vmem:[#allocation45_spill] sm:$0xff] %v6230_v50  ;;  %v599_v62 = vand.u32 4294901760, %v598_v16  ;;  %v6248_v14 = vpack.c.bf16 %v2027_v2, %v2020_v11  ;;  %v7805_v16 = vand.u32 4294901760, %v6220_v24  ;;  %v7806_v40 = vand.u32 4294901760, %v6230_v50 }
  0x78   : > { %v6241_v3 = vsub.f32 %v5945_v20, %v7801_v59  ;;  %v6246_v7 = vsub.f32 %v5948_v23, %v7803_v15  ;;  %v606_v4 = vand.u32 4294901760, %v605_v60  ;;  %v2033_v9 = vsub.f32 %v6215_v5, %v7621_v1 }
  0x79   : > { %v2040_v49 = vsub.f32 %v6220_v24, %v7805_v16  ;;  %v612_v20 = vsub.f32 %v6230_v50, %v7806_v40  ;;  %v7807_v2 = vand.u32 4294901760, %v5959_v26 }
  0x7a   : > { %7802 = vst [vmem:[#allocation46_spill] sm:$0xff] %v6241_v3  ;;  %7804 = vst [vmem:[#allocation47_spill] sm:$0xff] %v6246_v7  ;;  %v7630_v59 = vand.u32 4294901760, %v6241_v3  ;;  %v7629_v23 = vand.u32 4294901760, %v6246_v7  ;;  %v6266_v60 = vpack.c.bf16 %v606_v4, %v599_v62  ;;  %v2034_v15 = vand.u32 4294901760, %v2033_v9 }
  0x7b   : > { %v6264_v11 = vsub.f32 %v5959_v26, %v7807_v2  ;;  %v2041_v1 = vand.u32 4294901760, %v2040_v49  ;;  %v613_v38 = vand.u32 4294901760, %v612_v20  ;;  %v6279_v26 = vpack.c.bf16 %v5928_v57, %v5923_v58 }
  0x7c   : > { %v619_v16 = vsub.f32 %v6241_v3, %v7630_v59  ;;  %v2047_v40 = vsub.f32 %v6246_v7, %v7629_v23  ;;  %v6286_v4 = vpack.c.bf16 %v5953_v21, %v5933_v55  ;;  %v6292_v2 = vpack.c.bf16 %v5987_v37, %v5982_v44 }
  0x7d   : > { %7808 = vst [vmem:[#allocation48_spill] sm:$0xff] %v6264_v11  ;;  %v7628_v29 = vand.u32 4294901760, %v6264_v11  ;;  %v6275_v28 = vpack.c.bf16 %v2041_v1, %v2034_v15  ;;  %v6296_v15 = vpack.c.bf16 %v6017_v45, %v6010_v17  ;;  %v6330_v23 = vpack.c.bf16 %v6183_v25, %v6175_v39 }
  0x7e   : > { %v620_v62 = vand.u32 4294901760, %v619_v16  ;;  %v2048_v9 = vand.u32 4294901760, %v2047_v40  ;;  %v6302_v40 = vpack.c.bf16 %v6040_v34, %v6030_v30  ;;  %v6334_v59 = vpack.c.bf16 %v6200_v53, %v6192_v63 }
  0x7f   : > { %v2054_v49 = vsub.f32 %v6264_v11, %v7628_v29  ;;  %v6326_v29 = vpack.c.bf16 %v6157_v46, %v6149_v6  ;;  %v6348_v46 = vpack.c.bf16 %v6264_v11, %v6246_v7  ;;  %v343_v25 = vstv %s342_s7 }
  0x80   : > { %v6288_v20 = vpack.c.bf16 %v620_v62, %v613_v38  ;;  %v6306_v38 = vpack.c.bf16 %v6060_v27, %v6055_v54  ;;  %v6310_v62 = vpack.c.bf16 %v6081_v41, %v6070_v47  ;;  %v1778_v39 = vstv %s1777_s8 }
  0x81   : > { %v2055_v1 = vand.u32 4294901760, %v2054_v49  ;;  %v6314_v49 = vpack.c.bf16 %v6104_v36, %v6086_v48  ;;  %v6351_v6 = vadd.s32 %v343_v25, %v5682_v10  ;;  %v6354_v53 = vadd.s32 %v1778_v39, %v5682_v10 }
  0x82   : > { %v7809_v25 = vmov 0  }
  0x83   : > { %v6298_v16 = vpack.c.bf16 %v2055_v1, %v2048_v9  ;;  %v6318_v9 = vpack.c.bf16 %v6126_v61, %v6111_v18  ;;  %v6322_v1 = vpack.c.bf16 %v6139_v51, %v6131_v43  ;;  %v6338_v61 = vpack.c.bf16 %v6220_v24, %v6215_v5 }
  0x84   : > { %v6344_v51 = vpack.c.bf16 %v6241_v3, %v6230_v50 }
  0xa1   : > { %v235_v24 = vpop.permute.xlu1 %234  ;;  %v232_v5 = vpop.permute.xlu0 %231 }
  0xa2   : > { %vm237_vm5 = vcmp.eq.s32.totalorder %v235_v24, %v5685_v12  ;;  %vm346_vm6 = vcmp.eq.s32.totalorder %v235_v24, %v6351_v6  ;;  %vm2534_vm7 = vcmp.eq.s32.totalorder %v235_v24, %v5688_v13  ;;  %vm1781_vm8 = vcmp.eq.s32.totalorder %v235_v24, %v6354_v53 }
  0xa3   : > { %vm236_vm9 = vcmp.eq.s32.totalorder %v232_v5, %v5685_v12  ;;  %vm345_vm10 = vcmp.eq.s32.totalorder %v232_v5, %v6351_v6  ;;  %vm2533_vm11 = vcmp.eq.s32.totalorder %v232_v5, %v5688_v13  ;;  %v239_v11 = vsel %vm237_vm5, 1, %v7809_v25 }
  0xa4   : > { %v348_v10 = vsel %vm346_vm6, 1, %v7809_v25  ;;  %vm1780_vm12 = vcmp.eq.s32.totalorder %v232_v5, %v6354_v53  ;;  %v1783_v39 = vsel %vm1781_vm8, 1, %v7809_v25  ;;  %v2536_v7 = vsel %vm2534_vm7, 1, %v7809_v25 }
  0xa5   : > { %v238_v3 = vsel %vm236_vm9, 1, %v7809_v25  ;;  %v347_v24 = vsel %vm345_vm10, 1, %v7809_v25  ;;  %v1782_v5 = vsel %vm1780_vm12, 1, %v7809_v25  ;;  %v2535_v43 = vsel %vm2533_vm11, 1, %v7809_v25 }
  0xa6   : > { %v245_v50 = vpop.permute.xlu1 %244  ;;  %v242_v63 = vpop.permute.xlu0 %241 }
  0xa7   : > { %vm247_vm13 = vcmp.eq.s32.totalorder %v245_v50, %v5685_v12  ;;  %vm350_vm14 = vcmp.eq.s32.totalorder %v245_v50, %v6351_v6  ;;  %vm1785_vm15 = vcmp.eq.s32.totalorder %v245_v50, %v6354_v53  ;;  %vm2538_vm0 = vcmp.eq.s32.totalorder %v245_v50, %v5688_v13 }
  0xa8   : > { %v249_v18 = vsel %vm247_vm13, 1, %v7809_v25  ;;  %v2540_v36 = vsel %vm2538_vm0, 1, %v7809_v25  ;;  %v352_v41 = vsel %vm350_vm14, 1, %v7809_v25  ;;  %v1787_v47 = vsel %vm1785_vm15, 1, %v7809_v25 }
  0xa9   : > { %v251_v48 = vadd.s32 %v249_v18, %v239_v11  ;;  %v2542_v27 = vadd.s32 %v2540_v36, %v2536_v7  ;;  %vm246_vm1 = vcmp.eq.s32.totalorder %v242_v63, %v5685_v12  ;;  %vm349_vm2 = vcmp.eq.s32.totalorder %v242_v63, %v6351_v6 }
  0xaa   : > { %vm1784_vm3 = vcmp.eq.s32.totalorder %v242_v63, %v6354_v53  ;;  %vm2537_vm4 = vcmp.eq.s32.totalorder %v242_v63, %v5688_v13  ;;  %v248_v50 = vsel %vm246_vm1, 1, %v7809_v25  ;;  %v351_v54 = vsel %vm349_vm2, 1, %v7809_v25 }
  0xab   : > { %v1786_v34 = vsel %vm1784_vm3, 1, %v7809_v25  ;;  %v2539_v18 = vsel %vm2537_vm4, 1, %v7809_v25  ;;  %v254_v11 = vpop.permute.xlu1 %253  ;;  %v250_v30 = vadd.s32 %v248_v50, %v238_v3  ;;  %v353_v45 = vadd.s32 %v351_v54, %v347_v24  ;;  %v257_v63 = vpop.permute.xlu0 %256 }
  0xac   : > { %v1788_v36 = vadd.s32 %v1786_v34, %v1782_v5  ;;  %v2541_v7 = vadd.s32 %v2539_v18, %v2535_v43  ;;  %vm258_vm5 = vcmp.eq.s32.totalorder %v254_v11, %v5685_v12  ;;  %vm355_vm6 = vcmp.eq.s32.totalorder %v254_v11, %v6351_v6 }
  0xad   : > { %vm1790_vm7 = vcmp.eq.s32.totalorder %v254_v11, %v6354_v53  ;;  %vm2543_vm8 = vcmp.eq.s32.totalorder %v254_v11, %v5688_v13  ;;  %v260_v17 = vsel %vm258_vm5, 1, %v7809_v25  ;;  %v357_v37 = vsel %vm355_vm6, 1, %v7809_v25 }
  0xae   : > { %v1792_v44 = vsel %vm1790_vm7, 1, %v7809_v25  ;;  %v2545_v3 = vsel %vm2543_vm8, 1, %v7809_v25  ;;  %v354_v54 = vadd.s32 %v352_v41, %v348_v10  ;;  %v1789_v34 = vadd.s32 %v1787_v47, %v1783_v39 }
  0xaf   : > { %v262_v43 = vadd.s32 %v260_v17, %v250_v30  ;;  %v2547_v24 = vadd.s32 %v2545_v3, %v2541_v7  ;;  %vm259_vm9 = vcmp.eq.s32.totalorder %v257_v63, %v5685_v12  ;;  %vm356_vm10 = vcmp.eq.s32.totalorder %v257_v63, %v6351_v6 }
  0xb0   : > { %vm1791_vm11 = vcmp.eq.s32.totalorder %v257_v63, %v6354_v53  ;;  %vm2544_vm12 = vcmp.eq.s32.totalorder %v257_v63, %v5688_v13  ;;  %v266_v5 = vpop.permute.xlu1 %265  ;;  %v359_v50 = vadd.s32 %v357_v37, %v353_v45  ;;  %v1794_v18 = vadd.s32 %v1792_v44, %v1788_v36  ;;  %v278_v37 = vpop.permute.xlu0 %277 }
  0xb1   : > { %v261_v11 = vsel %vm259_vm9, 1, %v7809_v25  ;;  %v2546_v21 = vsel %vm2544_vm12, 1, %v7809_v25  ;;  %v358_v47 = vsel %vm356_vm10, 1, %v7809_v25  ;;  %v1793_v17 = vsel %vm1791_vm11, 1, %v7809_v25 }
  0xb2   : > { %v263_v55 = vadd.s32 %v261_v11, %v251_v48  ;;  %v2548_v30 = vadd.s32 %v2546_v21, %v2542_v27  ;;  %vm270_vm13 = vcmp.eq.s32.totalorder %v266_v5, %v5685_v12  ;;  %vm361_vm14 = vcmp.eq.s32.totalorder %v266_v5, %v6351_v6 }
  0xb3   : > { %vm1796_vm15 = vcmp.eq.s32.totalorder %v266_v5, %v6354_v53  ;;  %vm2549_vm0 = vcmp.eq.s32.totalorder %v266_v5, %v5688_v13  ;;  %v272_v44 = vsel %vm270_vm13, 1, %v7809_v25  ;;  %v363_v45 = vsel %vm361_vm14, 1, %v7809_v25 }
  0xb4   : > { %v1798_v41 = vsel %vm1796_vm15, 1, %v7809_v25  ;;  %v2551_v48 = vsel %vm2549_vm0, 1, %v7809_v25  ;;  %v269_v10 = vpop.permute.xlu1 %268  ;;  %v274_v39 = vadd.s32 %v272_v44, %v262_v43  ;;  %v365_v21 = vadd.s32 %v363_v45, %v359_v50 }
  0xb5   : > { %v1800_v27 = vadd.s32 %v1798_v41, %v1794_v18  ;;  %v2553_v36 = vadd.s32 %v2551_v48, %v2547_v24  ;;  %vm282_vm1 = vcmp.eq.s32.totalorder %v278_v37, %v5685_v12  ;;  %vm367_vm2 = vcmp.eq.s32.totalorder %v278_v37, %v6351_v6 }
  0xb6   : > { %vm1802_vm3 = vcmp.eq.s32.totalorder %v278_v37, %v6354_v53  ;;  %vm2555_vm4 = vcmp.eq.s32.totalorder %v278_v37, %v5688_v13  ;;  %v284_v7 = vsel %vm282_vm1, 1, %v7809_v25  ;;  %v369_v63 = vsel %vm367_vm2, 1, %v7809_v25 }
  0xb7   : > { %v1804_v3 = vsel %vm1802_vm3, 1, %v7809_v25  ;;  %v2557_v5 = vsel %vm2555_vm4, 1, %v7809_v25  ;;  %v360_v43 = vadd.s32 %v358_v47, %v354_v54  ;;  %v1795_v50 = vadd.s32 %v1793_v17, %v1789_v34  ;;  %v293_v17 = vpop.permute.xlu0 %292 }
  0xb8   : > { %v286_v18 = vadd.s32 %v284_v7, %v274_v39  ;;  %v2559_v24 = vadd.s32 %v2557_v5, %v2553_v36  ;;  %vm271_vm5 = vcmp.eq.s32.totalorder %v269_v10, %v5685_v12  ;;  %vm362_vm6 = vcmp.eq.s32.totalorder %v269_v10, %v6351_v6 }
  0xb9   : > { %vm1797_vm7 = vcmp.eq.s32.totalorder %v269_v10, %v6354_v53  ;;  %vm2550_vm8 = vcmp.eq.s32.totalorder %v269_v10, %v5688_v13  ;;  %v281_v11 = vpop.permute.xlu1 %280  ;;  %v371_v37 = vadd.s32 %v369_v63, %v365_v21  ;;  %v1806_v44 = vadd.s32 %v1804_v3, %v1800_v27 }
  0xba   : > { %v273_v45 = vsel %vm271_vm5, 1, %v7809_v25  ;;  %v2552_v41 = vsel %vm2550_vm8, 1, %v7809_v25  ;;  %v364_v54 = vsel %vm362_vm6, 1, %v7809_v25  ;;  %v1799_v34 = vsel %vm1797_vm7, 1, %v7809_v25 }
  0xbb   : > { %v275_v48 = vadd.s32 %v273_v45, %v263_v55  ;;  %v2554_v47 = vadd.s32 %v2552_v41, %v2548_v30  ;;  %vm283_vm9 = vcmp.eq.s32.totalorder %v281_v11, %v5685_v12  ;;  %vm368_vm10 = vcmp.eq.s32.totalorder %v281_v11, %v6351_v6 }
  0xbc   : > { %vm1803_vm11 = vcmp.eq.s32.totalorder %v281_v11, %v6354_v53  ;;  %vm2556_vm12 = vcmp.eq.s32.totalorder %v281_v11, %v5688_v13  ;;  %v285_v10 = vsel %vm283_vm9, 1, %v7809_v25  ;;  %v370_v39 = vsel %vm368_vm10, 1, %v7809_v25 }
  0xbd   : > { %v1805_v55 = vsel %vm1803_vm11, 1, %v7809_v25  ;;  %v2558_v21 = vsel %vm2556_vm12, 1, %v7809_v25  ;;  %v366_v27 = vadd.s32 %v364_v54, %v360_v43  ;;  %v1801_v36 = vadd.s32 %v1799_v34, %v1795_v50 }
  0xbe   : > { %v287_v30 = vadd.s32 %v285_v10, %v275_v48  ;;  %v2560_v7 = vadd.s32 %v2558_v21, %v2554_v47  ;;  %v290_v63 = vpop.permute.xlu1 %289  ;;  %vm295_vm13 = vcmp.eq.s32.totalorder %v293_v17, %v5685_v12  ;;  %vm374_vm14 = vcmp.eq.s32.totalorder %v293_v17, %v6351_v6 }
  0xbf   : > { %vm1809_vm15 = vcmp.eq.s32.totalorder %v293_v17, %v6354_v53  ;;  %vm2562_vm0 = vcmp.eq.s32.totalorder %v293_v17, %v5688_v13  ;;  %v372_v3 = vadd.s32 %v370_v39, %v366_v27  ;;  %v1807_v5 = vadd.s32 %v1805_v55, %v1801_v36  ;;  %v314_v36 = vpop.permute.xlu0 %313 }
  0xc0   : > { %v297_v11 = vsel %vm295_vm13, 1, %v7809_v25  ;;  %v2564_v45 = vsel %vm2562_vm0, 1, %v7809_v25  ;;  %v376_v43 = vsel %vm374_vm14, 1, %v7809_v25  ;;  %v1811_v50 = vsel %vm1809_vm15, 1, %v7809_v25 }
  0xc1   : > { %v299_v41 = vadd.s32 %v297_v11, %v287_v30  ;;  %v6444_v48 = vadd.s32 %v2564_v45, %v2560_v7  ;;  %vm294_vm1 = vcmp.eq.s32.totalorder %v290_v63, %v5685_v12  ;;  %vm373_vm2 = vcmp.eq.s32.totalorder %v290_v63, %v6351_v6 }
  0xc2   : > { %vm1808_vm3 = vcmp.eq.s32.totalorder %v290_v63, %v6354_v53  ;;  %vm2561_vm4 = vcmp.eq.s32.totalorder %v290_v63, %v5688_v13  ;;  %v296_v54 = vsel %vm294_vm1, 1, %v7809_v25  ;;  %v375_v34 = vsel %vm373_vm2, 1, %v7809_v25 }
  0xc3   : > { %v1810_v47 = vsel %vm1808_vm3, 1, %v7809_v25  ;;  %v2563_v17 = vsel %vm2561_vm4, 1, %v7809_v25  ;;  %v302_v10 = vpop.permute.xlu1 %301  ;;  %v298_v39 = vadd.s32 %v296_v54, %v286_v18  ;;  %v377_v55 = vadd.s32 %v375_v34, %v371_v37 }
  0xc4   : > { %v1812_v21 = vadd.s32 %v1810_v47, %v1806_v44  ;;  %v2565_v27 = vadd.s32 %v2563_v17, %v2559_v24  ;;  %vm306_vm5 = vcmp.eq.s32.totalorder %v302_v10, %v5685_v12  ;;  %vm379_vm6 = vcmp.eq.s32.totalorder %v302_v10, %v6351_v6 }
  0xc5   : > { %vm1814_vm7 = vcmp.eq.s32.totalorder %v302_v10, %v6354_v53  ;;  %vm2567_vm8 = vcmp.eq.s32.totalorder %v302_v10, %v5688_v13  ;;  %v308_v30 = vsel %vm306_vm5, 1, %v7809_v25  ;;  %v381_v7 = vsel %vm379_vm6, 1, %v7809_v25 }
  0xc6   : > { %v1816_v63 = vsel %vm1814_vm7, 1, %v7809_v25  ;;  %v2569_v18 = vsel %vm2567_vm8, 1, %v7809_v25  ;;  %v310_v37 = vadd.s32 %v308_v30, %v298_v39  ;;  %v383_v44 = vadd.s32 %v381_v7, %v377_v55 }
  0xc7   : > { %v1818_v24 = vadd.s32 %v1816_v63, %v1812_v21  ;;  %v2571_v11 = vadd.s32 %v2569_v18, %v2565_v27  ;;  %v305_v45 = vpop.permute.xlu1 %304  ;;  %vm318_vm9 = vcmp.eq.s32.totalorder %v314_v36, %v5685_v12  ;;  %vm385_vm10 = vcmp.eq.s32.totalorder %v314_v36, %v6351_v6 }
  0xc8   : > { %vm1820_vm11 = vcmp.eq.s32.totalorder %v314_v36, %v6354_v53  ;;  %vm2573_vm12 = vcmp.eq.s32.totalorder %v314_v36, %v5688_v13  ;;  %v320_v54 = vsel %vm318_vm9, 1, %v7809_v25  ;;  %v387_v34 = vsel %vm385_vm10, 1, %v7809_v25 }
  0xc9   : > { %v1822_v47 = vsel %vm1820_vm11, 1, %v7809_v25  ;;  %v2575_v17 = vsel %vm2573_vm12, 1, %v7809_v25  ;;  %v6470_v10 = vadd.s32 %v320_v54, %v310_v37  ;;  %v389_v39 = vadd.s32 %v387_v34, %v383_v44 }
  0xca   : > { %v1824_v55 = vadd.s32 %v1822_v47, %v1818_v24  ;;  %v6472_v21 = vadd.s32 %v2575_v17, %v2571_v11  ;;  %vm307_vm13 = vcmp.eq.s32.totalorder %v305_v45, %v5685_v12  ;;  %vm380_vm14 = vcmp.eq.s32.totalorder %v305_v45, %v6351_v6 }
  0xcb   : > { %vm1815_vm15 = vcmp.eq.s32.totalorder %v305_v45, %v6354_v53  ;;  %vm2568_vm0 = vcmp.eq.s32.totalorder %v305_v45, %v5688_v13  ;;  %v391_v27 = vcvt.s32.f32 %v389_v39  ;;  %v378_v7 = vadd.s32 %v376_v43, %v372_v3 }
  0xcc   : > { %v1826_v36 = vcvt.s32.f32 %v1824_v55  ;;  %v317_v30 = vpop.permute.xlu1 %316  ;;  %v309_v63 = vsel %vm307_vm13, 1, %v7809_v25  ;;  %v382_v18 = vsel %vm380_vm14, 1, %v7809_v25  ;;  %v1813_v37 = vadd.s32 %v1811_v50, %v1807_v5 }
  0xcd   : > { %v6480_v44 = vand.u32 4294901760, %v391_v27  ;;  %v1817_v24 = vsel %vm1815_vm15, 1, %v7809_v25  ;;  %v2570_v11 = vsel %vm2568_vm0, 1, %v7809_v25  ;;  %v311_v54 = vadd.s32 %v309_v63, %v299_v41 }
  0xce   : > { %vm319_vm1 = vcmp.eq.s32.totalorder %v317_v30, %v5685_v12  ;;  %v384_v34 = vadd.s32 %v382_v18, %v378_v7  ;;  %vm386_vm2 = vcmp.eq.s32.totalorder %v317_v30, %v6351_v6  ;;  %v6486_v45 = vand.u32 4294901760, %v1826_v36 }
  0xcf   : > { %v321_v3 = vsel %vm319_vm1, 1, %v7809_v25  ;;  %v388_v43 = vsel %vm386_vm2, 1, %v7809_v25  ;;  %v1819_v50 = vadd.s32 %v1817_v24, %v1813_v37  ;;  %vm1821_vm3 = vcmp.eq.s32.totalorder %v317_v30, %v6354_v53 }
  0xd0   : > { %v6490_v47 = vadd.s32 %v321_v3, %v311_v54  ;;  %v390_v5 = vadd.s32 %v388_v43, %v384_v34  ;;  %v1823_v17 = vsel %vm1821_vm3, 1, %v7809_v25  ;;  %v2572_v41 = vadd.s32 %v2570_v11, %v6444_v48 }
  0xd1   : > { %vm2574_vm4 = vcmp.eq.s32.totalorder %v317_v30, %v5688_v13  ;;  %v6497_v12 = vsub.f32 %v391_v27, %v6480_v44  ;;  %v1825_v39 = vadd.s32 %v1823_v17, %v1819_v50  ;;  %v6504_v18 = vsub.f32 %v1826_v36, %v6486_v45  ;;  %v7840_v17 = vld [vmem:[#allocation25_spill] sm:$0xff] }
  0xd2   : > { %v392_v6 = vcvt.s32.f32 %v390_v5  ;;  %v2576_v55 = vsel %vm2574_vm4, 1, %v7809_v25  ;;  %vm3287_vm5 = vcmask 130048  }
  0xd3   : > { %v6500_v7 = vadd.s32 %v2576_v55, %v2572_v41  ;;  %v492_v63 = vand.u32 4294901760, %v6497_v12  ;;  %v1827_v37 = vcvt.s32.f32 %v1825_v39  ;;  %v1927_v48 = vand.u32 4294901760, %v6504_v18  ;;  %v7844_v55 = vld [vmem:[#allocation27_spill] sm:$0xff] }
  0xd4   : > { %v6506_v53 = vand.u32 4294901760, %v392_v6  ;;  %v7841_v41 = vand.u32 4294901760, %v7840_v17  ;;  %v7872_v17 = vld [vmem:[#allocation41_spill] sm:$0xff] }
  0xd5   : > { %v493_v13 = vsub.f32 %v6497_v12, %v492_v63  ;;  %v6515_v25 = vand.u32 4294901760, %v1827_v37  ;;  %v1928_v36 = vsub.f32 %v6504_v18, %v1927_v48 }
  0xd6   : > { %v6513_v27 = vsub.f32 %v392_v6, %v6506_v53 }
  0xd7   : > { %v494_v30 = vand.u32 4294901760, %v493_v13  ;;  %v6521_v24 = vsub.f32 %v1827_v37, %v6515_v25  ;;  %v1929_v54 = vand.u32 4294901760, %v1928_v36 }
  0xd8   : > { %v502_v11 = vand.u32 4294901760, %v6513_v27 }
  0xd9   : > { %3868 = vmatprep.mubr.f32.mxu1 %v494_v30  ;;  %v1937_v3 = vand.u32 4294901760, %v6521_v24  ;;  %4288 = vmatprep.mubr.f32.mxu0 %v1929_v54  ;;  %v7850_v30 = vld [vmem:[#allocation30_spill] sm:$0xff] }
  0xda   : > { %v503_v34 = vsub.f32 %v6513_v27, %v502_v11  ;;  %v7851_v36 = vand.u32 4294901760, %v7850_v30  ;;  %v7882_v30 = vld [vmem:[#allocation46_spill] sm:$0xff] }
  0xdb   : > { %v1938_v5 = vsub.f32 %v6521_v24, %v1937_v3 }
  0xdc   : > { %v504_v43 = vand.u32 4294901760, %v503_v34  ;;  %v7854_v34 = vld [vmem:[#allocation32_spill] sm:$0xff] }
  0xdd   : > { %v1939_v50 = vand.u32 4294901760, %v1938_v5  ;;  %v7856_v5 = vld [vmem:[#allocation33_spill] sm:$0xff] }
  0xde   : > { %3869 = vmatmul.mubr.f32.vlgmr.msra.gmra.mrb[0].mxu1 %v504_v43 }
  0xdf   : > { %4711 = vmatpush3.bf16.msra.mxu1 %v6032_v33  ;;  %3903 = vmatprep.mubr.f32.mxu1 %v6480_v44  ;;  %v7812_v33 = vld [vmem:[#allocation5_spill] sm:$0xff] }
  0xe0   : > { %4289 = vmatmul.mubr.f32.vlgmr.msra.gmra.mrb[0].mxu0 %v1939_v50  ;;  %4713 = vmatprep.subr.bf16.mxu1 %v6062_v31  ;;  %v7857_v50 = vand.u32 4294901760, %v7856_v5  ;;  %v6770_v5 = vld [vmem:[%s5661_s28 + $0x10] sm:$0xff] }
  0xe1   : > { %5095 = vmatpush3.bf16.msra.mxu0 %v6034_v35  ;;  %4323 = vmatprep.mubr.f32.mxu0 %v6486_v45  ;;  %v7813_v35 = vld [vmem:[#allocation6_spill] sm:$0xff] }
  0xe2   : > { %5097 = vmatprep.subr.bf16.mxu0 %v6088_v22 }
  0xe3   : > { %4715 = vmatpush3.bf16.msra.mxu1 %v6062_v31  ;;  %v7814_v31 = vld [vmem:[#allocation7_spill] sm:$0xff] }
  0xe4   : > { %4717 = vmatprep.subr.bf16.mxu1 %v6106_v42 }
  0xe5   : > { %5099 = vmatpush3.bf16.msra.mxu0 %v6088_v22  ;;  %v7815_v22 = vld [vmem:[#allocation8_spill] sm:$0xff] }
  0xe6   : > { %5101 = vmatprep.subr.bf16.mxu0 %v6120_v32 }
  0xe7   : > { %4719 = vmatpush3.bf16.msra.mxu1 %v6106_v42  ;;  %v7816_v42 = vld [vmem:[#allocation9_spill] sm:$0xff] }
  0xe8   : > { %4721 = vmatprep.subr.bf16.mxu1 %v6151_v19 }
  0xe9   : > { %5103 = vmatpush3.bf16.msra.mxu0 %v6120_v32  ;;  %v7817_v32 = vld [vmem:[#allocation10_spill] sm:$0xff] }
  0xea   : > { %5105 = vmatprep.subr.bf16.mxu0 %v6166_v52 }
  0xeb   : > { %4723 = vmatpush3.bf16.msra.mxu1 %v6151_v19  ;;  %v7820_v19 = vld [vmem:[#allocation13_spill] sm:$0xff] }
  0xec   : > { %4725 = vmatprep.subr.bf16.mxu1 %v6194_v8 }
  0xed   : > { %5107 = vmatpush3.bf16.msra.mxu0 %v6166_v52  ;;  %v7822_v52 = vld [vmem:[#allocation15_spill] sm:$0xff] }
  0xee   : > { %5109 = vmatprep.subr.bf16.mxu0 %v6202_v56 }
  0xef   : > { %4727 = vmatpush3.bf16.msra.mxu1 %v6194_v8  ;;  %v7823_v8 = vld [vmem:[#allocation17_spill] sm:$0xff] }
  0xf0   : > { %4729 = vmatprep.subr.bf16.mxu1 %v6222_v0 }
  0xf1   : > { %5111 = vmatpush3.bf16.msra.mxu0 %v6202_v56  ;;  %v7824_v56 = vld [vmem:[#allocation19_spill] sm:$0xff] }
  0xf2   : > { %5113 = vmatprep.subr.bf16.mxu0 %v6248_v14 }
  0xf3   : > { %4731 = vmatpush3.bf16.msra.mxu1 %v6222_v0  ;;  %v7825_v0 = vand.u32 4294901760, %v5923_v58 }
  0xf4   : > { %4733 = vmatprep.subr.bf16.mxu1 %v6266_v60 }
  0xf5   : > { %5115 = vmatpush3.bf16.msra.mxu0 %v6248_v14  ;;  %v7826_v14 = vand.u32 4294901760, %v5928_v57  ;;  %v7836_v57 = vld [vmem:[#allocation23_spill] sm:$0xff] }
  0xf6   : > { %5117 = vmatprep.subr.bf16.mxu0 %v6275_v28 }
  0xf7   : > { %4735 = vmatpush3.bf16.msra.mxu1 %v6266_v60  ;;  %v7828_v60 = vld [vmem:[#allocation16_spill] sm:$0xff] }
  0xf8   : > { %4737 = vmatprep.subr.bf16.mxu1 %v6288_v20 }
  0xf9   : > { %5119 = vmatpush3.bf16.msra.mxu0 %v6275_v28  ;;  %v7810_v28 = vld [vmem:[#allocation3_spill] sm:$0xff] }
  0xfa   : > { %5121 = vmatprep.subr.bf16.mxu0 %v6298_v16 }
  0xfb   : > { %4739 = vmatpush3.bf16.msra.mxu1 %v6288_v20 }
  0xfc   : > { %4741 = vmatprep.subr.bf16.mxu1 %v6279_v26 }
  0xfd   : > { %5123 = vmatpush3.bf16.msra.mxu0 %v6298_v16 }
  0xfe   : > { %3904 = vmatmul.mubr.f32.vlgmr.msra.gmra.mrb[0].mxu1 %v6506_v53  ;;  %5125 = vmatprep.subr.bf16.mxu0 %v6286_v4 }
  0xff   : > { %4743 = vmatpush3.bf16.msra.mxu1 %v6279_v26  ;;  %3938 = vmatprep.mubr.f32.mxu1 %v6497_v12  ;;  %v7829_v26 = vand.u32 4294901760, %v7828_v60  ;;  %v7842_v12 = vld [vmem:[#allocation26_spill] sm:$0xff]  ;;  %v7860_v60 = vld [vmem:[#allocation35_spill] sm:$0xff] }
 0x100   : > { %4324 = vmatmul.mubr.f32.vlgmr.msra.gmra.mrb[0].mxu0 %v6515_v25  ;;  %4745 = vmatprep.subr.bf16.mxu1 %v6292_v2  ;;  %v7843_v6 = vand.u32 4294901760, %v7842_v12  ;;  %v7874_v12 = vld [vmem:[#allocation42_spill] sm:$0xff] }
 0x101   : > { %5127 = vmatpush3.bf16.msra.mxu0 %v6286_v4  ;;  %4358 = vmatprep.mubr.f32.mxu0 %v6504_v18  ;;  %v7830_v4 = vld [vmem:[#allocation18_spill] sm:$0xff]  ;;  %v7846_v18 = vld [vmem:[#allocation28_spill] sm:$0xff] }
 0x102   : > { %5129 = vmatprep.subr.bf16.mxu0 %v6296_v15  ;;  %v7831_v20 = vand.u32 4294901760, %v7830_v4  ;;  %v4812_v39 = vpack.c.bf16 %v7843_v6, %v7841_v41  ;;  %v7847_v37 = vand.u32 4294901760, %v7846_v18  ;;  %v7862_v4 = vld [vmem:[#allocation36_spill] sm:$0xff]  ;;  %v7873_v41 = vand.u32 4294901760, %v7872_v17 }
 0x103   : > { %4747 = vmatpush3.bf16.msra.mxu1 %v6292_v2  ;;  %v7875_v6 = vand.u32 4294901760, %v7874_v12  ;;  %v7878_v18 = vld [vmem:[#allocation44_spill] sm:$0xff] }
 0x104   : > { %4749 = vmatprep.subr.bf16.mxu1 %v6302_v40  ;;  %v5188_v2 = vpack.c.bf16 %v7831_v20, %v7829_v26  ;;  %v7861_v26 = vand.u32 4294901760, %v7860_v60  ;;  %v7863_v20 = vand.u32 4294901760, %v7862_v4  ;;  %v6781_v60 = vld [vmem:[%s5661_s28 + $0x190] sm:$0xff] }
 0x105   : > { %5131 = vmatpush3.bf16.msra.mxu0 %v6296_v15  ;;  %v7832_v15 = vld [vmem:[#allocation20_spill] sm:$0xff] }
 0x106   : > { %5133 = vmatprep.subr.bf16.mxu0 %v6306_v38  ;;  %v7833_v16 = vand.u32 4294901760, %v7832_v15  ;;  %v7864_v15 = vld [vmem:[#allocation37_spill] sm:$0xff] }
 0x107   : > { %4751 = vmatpush3.bf16.msra.mxu1 %v6302_v40  ;;  %v7834_v40 = vld [vmem:[#allocation21_spill] sm:$0xff] }
 0x108   : > { %4753 = vmatprep.subr.bf16.mxu1 %v6310_v62 }
 0x109   : > { %5135 = vmatpush3.bf16.msra.mxu0 %v6306_v38  ;;  %v7835_v38 = vand.u32 4294901760, %v7834_v40  ;;  %v7866_v40 = vld [vmem:[#allocation38_spill] sm:$0xff] }
 0x10a   : > { %5137 = vmatprep.subr.bf16.mxu0 %v6314_v49 }
 0x10b   : > { %4755 = vmatpush3.bf16.msra.mxu1 %v6310_v62  ;;  %v4808_v58 = vpack.c.bf16 %v7835_v38, %v7833_v16  ;;  %v7837_v62 = vand.u32 4294901760, %v7836_v57  ;;  %v7865_v16 = vand.u32 4294901760, %v7864_v15  ;;  %v7867_v38 = vand.u32 4294901760, %v7866_v40  ;;  %v7868_v57 = vld [vmem:[#allocation39_spill] sm:$0xff]  ;;  %v6809_v40 = vld [vmem:[%s5661_s28 + $0x28] sm:$0xff] }
 0x10c   : > { %4757 = vmatprep.subr.bf16.mxu1 %v6318_v9  ;;  %v7669_v17 = vand.u32 4294901760, %v6809_v40 }
 0x10d   : > { %5139 = vmatpush3.bf16.msra.mxu0 %v6314_v49  ;;  %v7838_v49 = vld [vmem:[#allocation24_spill] sm:$0xff] }
 0x10e   : > { %5141 = vmatprep.subr.bf16.mxu0 %v6322_v1 }
 0x10f   : > { %4759 = vmatpush3.bf16.msra.mxu1 %v6318_v9  ;;  %v7839_v9 = vand.u32 4294901760, %v7838_v49  ;;  %v7870_v49 = vld [vmem:[#allocation40_spill] sm:$0xff] }
 0x110   : > { %4761 = vmatprep.subr.bf16.mxu1 %v6326_v29 }
 0x111   : > { %5143 = vmatpush3.bf16.msra.mxu0 %v6322_v1  ;;  %v5192_v1 = vpack.c.bf16 %v7839_v9, %v7837_v62  ;;  %v7869_v62 = vand.u32 4294901760, %v7868_v57  ;;  %v7871_v9 = vand.u32 4294901760, %v7870_v49  ;;  %v6821_v57 = vld [vmem:[%s5661_s28 + $0x1a0] sm:$0xff] }
 0x112   : > { %5145 = vmatprep.subr.bf16.mxu0 %v6330_v23  ;;  %v7668_v12 = vand.u32 4294901760, %v6821_v57 }
 0x113   : > { %4763 = vmatpush3.bf16.msra.mxu1 %v6326_v29  ;;  %v7811_v29 = vld [vmem:[#allocation4_spill] sm:$0xff] }
 0x114   : > { %4765 = vmatprep.subr.bf16.mxu1 %v6334_v59 }
 0x115   : > { %5147 = vmatpush3.bf16.msra.mxu0 %v6330_v23  ;;  %v7827_v23 = vld [vmem:[#allocation22_spill] sm:$0xff] }
 0x116   : > { %5149 = vmatprep.subr.bf16.mxu0 %v6338_v61 }
 0x117   : > { %4767 = vmatpush3.bf16.msra.mxu1 %v6334_v59  ;;  %v4804_v59 = vpack.c.bf16 %v7826_v14, %v7825_v0  ;;  %v7858_v0 = vld [vmem:[#allocation34_spill] sm:$0xff] }
 0x118   : > { %4769 = vmatprep.subr.bf16.mxu1 %v6344_v51  ;;  %v7859_v14 = vand.u32 4294901760, %v7858_v0 }
 0x119   : > { %5151 = vmatpush3.bf16.msra.mxu0 %v6338_v61  ;;  %v7818_v61 = vld [vmem:[#allocation11_spill] sm:$0xff] }
 0x11a   : > { %5153 = vmatprep.subr.bf16.mxu0 %v6348_v46 }
 0x11b   : > { %4771 = vmatpush3.bf16.msra.mxu1 %v6344_v51  ;;  %v7819_v51 = vld [vmem:[#allocation12_spill] sm:$0xff] }
 0x11c   : > { %4773 = vmatprep.subr.bf16.mxu1 %v7810_v28 }
 0x11d   : > { %5155 = vmatpush3.bf16.msra.mxu0 %v6348_v46  ;;  %v7821_v46 = vld [vmem:[#allocation14_spill] sm:$0xff] }
 0x11e   : > { %3939 = vmatmul.mubr.f32.vlgmr.msra.gmra.mrb[0].mxu1 %v6513_v27  ;;  %5157 = vmatprep.subr.bf16.mxu0 %v7811_v29 }
 0x11f   : > { %4775 = vmatpush3.bf16.msra.mxu1 %v7810_v28  ;;  %3973 = vmatprep.mubr.f32.mxu1 %v492_v63  ;;  %v7845_v63 = vand.u32 4294901760, %v7844_v55  ;;  %v7876_v55 = vld [vmem:[#allocation43_spill] sm:$0xff] }
 0x120   : > { %4359 = vmatmul.mubr.f32.vlgmr.msra.gmra.mrb[0].mxu0 %v6521_v24  ;;  %4777 = vmatprep.subr.bf16.mxu1 %v7812_v33 }
 0x121   : > { %5159 = vmatpush3.bf16.msra.mxu0 %v7811_v29  ;;  %4393 = vmatprep.mubr.f32.mxu0 %v1927_v48  ;;  %v5196_v13 = vpack.c.bf16 %v7847_v37, %v7845_v63  ;;  %v7848_v48 = vld [vmem:[#allocation29_spill] sm:$0xff]  ;;  %v7877_v63 = vand.u32 4294901760, %v7876_v55  ;;  %v7879_v37 = vand.u32 4294901760, %v7878_v18  ;;  %v6847_v55 = vld [vmem:[%s5661_s28 + $0x38] sm:$0xff]  ;;  %v6859_v18 = vld [vmem:[%s5661_s28 + $0x1b0] sm:$0xff] }
 0x122   : > { %5161 = vmatprep.subr.bf16.mxu0 %v7813_v35  ;;  %v7849_v27 = vand.u32 4294901760, %v7848_v48  ;;  %v7880_v48 = vld [vmem:[#allocation45_spill] sm:$0xff] }
 0x123   : > { %4779 = vmatpush3.bf16.msra.mxu1 %v7812_v33 }
 0x124   : > { %4781 = vmatprep.subr.bf16.mxu1 %v7814_v31  ;;  %v4816_v24 = vpack.c.bf16 %v7851_v36, %v7849_v27  ;;  %v7881_v27 = vand.u32 4294901760, %v7880_v48  ;;  %v7883_v36 = vand.u32 4294901760, %v7882_v30  ;;  %v6869_v48 = vld [vmem:[%s5661_s28 + $0x48] sm:$0xff] }
 0x125   : > { %5163 = vmatpush3.bf16.msra.mxu0 %v7813_v35 }
 0x126   : > { %5165 = vmatprep.subr.bf16.mxu0 %v7815_v22 }
 0x127   : > { %4783 = vmatpush3.bf16.msra.mxu1 %v7814_v31 }
 0x128   : > { %4785 = vmatprep.subr.bf16.mxu1 %v7816_v42 }
 0x129   : > { %5167 = vmatpush3.bf16.msra.mxu0 %v7815_v22 }
 0x12a   : > { %5169 = vmatprep.subr.bf16.mxu0 %v7817_v32 }
 0x12b   : > { %4787 = vmatpush3.bf16.msra.mxu1 %v7816_v42 }
 0x12c   : > { %4789 = vmatprep.subr.bf16.mxu1 %v7818_v61 }
 0x12d   : > { %5171 = vmatpush3.bf16.msra.mxu0 %v7817_v32 }
 0x12e   : > { %5173 = vmatprep.subr.bf16.mxu0 %v7819_v51 }
 0x12f   : > { %4791 = vmatpush3.bf16.msra.mxu1 %v7818_v61 }
 0x130   : > { %4793 = vmatprep.subr.bf16.mxu1 %v7820_v19 }
 0x131   : > { %5175 = vmatpush3.bf16.msra.mxu0 %v7819_v51 }
 0x132   : > { %5177 = vmatprep.subr.bf16.mxu0 %v7821_v46 }
 0x133   : > { %4795 = vmatpush3.bf16.msra.mxu1 %v7820_v19 }
 0x134   : > { %4797 = vmatprep.subr.bf16.mxu1 %v7822_v52 }
 0x135   : > { %5179 = vmatpush3.bf16.msra.mxu0 %v7821_v46 }
 0x136   : > { %5181 = vmatprep.subr.bf16.mxu0 %v7823_v8 }
 0x137   : > { %4799 = vmatpush3.bf16.msra.mxu1 %v7822_v52 }
 0x138   : > { %4801 = vmatprep.subr.bf16.mxu1 %v7824_v56 }
 0x139   : > { %5183 = vmatpush3.bf16.msra.mxu0 %v7823_v8 }
 0x13a   : > { %5185 = vmatprep.subr.bf16.mxu0 %v7827_v23 }
 0x13b   : > { %4803 = vmatpush3.bf16.msra.mxu1 %v7824_v56 }
 0x13c   : > { %4805 = vmatprep.subr.bf16.mxu1 %v4804_v59 }
 0x13d   : > { %5187 = vmatpush3.bf16.msra.mxu0 %v7827_v23 }
 0x13e   : > { %3974 = vmatmul.mubr.f32.vlgmr.msra.gmra.mrb[0].mxu1 %v502_v11  ;;  %5189 = vmatprep.subr.bf16.mxu0 %v5188_v2  ;;  %v7852_v11 = vld [vmem:[#allocation31_spill] sm:$0xff] }
 0x13f   : > { %4807 = vmatpush3.bf16.msra.mxu1 %v4804_v59  ;;  %4008 = vmatprep.mubr.f32.mxu1 %v6480_v44  ;;  %v7853_v54 = vand.u32 4294901760, %v7852_v11  ;;  %v4820_v59 = vpack.c.bf16 %v7859_v14, %v7857_v50  ;;  %v7884_v11 = vld [vmem:[#allocation47_spill] sm:$0xff]  ;;  %v6773_v50 = vld [vmem:[%s5661_s28 + $0x18] sm:$0xff] }
 0x140   : > { %4394 = vmatmul.mubr.f32.vlgmr.msra.gmra.mrb[0].mxu0 %v1937_v3  ;;  %4809 = vmatprep.subr.bf16.mxu1 %v4808_v58  ;;  %v7855_v3 = vand.u32 4294901760, %v7854_v34  ;;  %v7886_v34 = vld [vmem:[#allocation48_spill] sm:$0xff] }
 0x141   : > { %5191 = vmatpush3.bf16.msra.mxu0 %v5188_v2  ;;  %4428 = vmatprep.mubr.f32.mxu0 %v6486_v45  ;;  %v5204_v2 = vpack.c.bf16 %v7863_v20, %v7861_v26  ;;  %v1103_v20 = vand.u32 4294901760, %v6773_v50 }
 0x142   : > { %5193 = vmatprep.subr.bf16.mxu0 %v5192_v1  ;;  %v5200_v43 = vpack.c.bf16 %v7855_v3, %v7853_v54  ;;  %v7885_v54 = vand.u32 4294901760, %v7884_v11  ;;  %v7887_v3 = vand.u32 4294901760, %v7886_v34  ;;  %v6885_v11 = vld [vmem:[%s5661_s28 + $0x1c8] sm:$0xff]  ;;  %v6898_v34 = vld [vmem:[%s5661_s28 + $0x58] sm:$0xff] }
 0x143   : > { %4811 = vmatpush3.bf16.msra.mxu1 %v4808_v58  ;;  %v4824_v58 = vpack.c.bf16 %v7867_v38, %v7865_v16  ;;  %v6806_v16 = vld [vmem:[%s5661_s28 + $0x20] sm:$0xff] }
 0x144   : > { %4813 = vmatprep.subr.bf16.mxu1 %v4812_v39 }
 0x145   : > { %5195 = vmatpush3.bf16.msra.mxu0 %v5192_v1  ;;  %v5208_v1 = vpack.c.bf16 %v7871_v9, %v7869_v62  ;;  %v6824_v62 = vld [vmem:[%s5661_s28 + $0x1a8] sm:$0xff] }
 0x146   : > { %5197 = vmatprep.subr.bf16.mxu0 %v5196_v13 }
 0x147   : > { %4815 = vmatpush3.bf16.msra.mxu1 %v4812_v39  ;;  %v4828_v39 = vpack.c.bf16 %v7875_v6, %v7873_v41  ;;  %v7665_v6 = vand.u32 4294901760, %v6824_v62 }
 0x148   : > { %4817 = vmatprep.subr.bf16.mxu1 %v4816_v24 }
 0x149   : > { %5199 = vmatpush3.bf16.msra.mxu0 %v5196_v13  ;;  %v5212_v13 = vpack.c.bf16 %v7879_v37, %v7877_v63 }
 0x14a   : > { %5201 = vmatprep.subr.bf16.mxu0 %v5200_v43 }
 0x14b   : > { %4819 = vmatpush3.bf16.msra.mxu1 %v4816_v24  ;;  %v4832_v24 = vpack.c.bf16 %v7883_v36, %v7881_v27  ;;  %v7666_v36 = vand.u32 4294901760, %v6847_v55 }
 0x14c   : > { %4821 = vmatprep.subr.bf16.mxu1 %v4820_v59 }
 0x14d   : > { %5203 = vmatpush3.bf16.msra.mxu0 %v5200_v43  ;;  %v5216_v43 = vpack.c.bf16 %v7887_v3, %v7885_v54  ;;  %v6895_v54 = vld [vmem:[%s5661_s28 + $0x50] sm:$0xff] }
 0x14e   : > { %5205 = vmatprep.subr.bf16.mxu0 %v5204_v2 }
 0x14f   : > { %4823 = vmatpush3.bf16.msra.mxu1 %v4820_v59 }
 0x150   : > { %4825 = vmatprep.subr.bf16.mxu1 %v4824_v58 }
 0x151   : > { %5207 = vmatpush3.bf16.msra.mxu0 %v5204_v2 }
 0x152   : > { %5209 = vmatprep.subr.bf16.mxu0 %v5208_v1 }
 0x153   : > { %4827 = vmatpush3.bf16.msra.mxu1 %v4824_v58  ;;  %v2604_v58 = vand.u32 4294901760, %v6781_v60 }
 0x154   : > { %4829 = vmatprep.subr.bf16.mxu1 %v4828_v39 }
 0x155   : > { %5211 = vmatpush3.bf16.msra.mxu0 %v5208_v1  ;;  %v7676_v1 = vand.u32 4294901760, %v6806_v16 }
 0x156   : > { %5213 = vmatprep.subr.bf16.mxu0 %v5212_v13 }
 0x157   : > { %4831 = vmatpush3.bf16.msra.mxu1 %v4828_v39  ;;  %v6844_v39 = vld [vmem:[%s5661_s28 + $0x30] sm:$0xff]  ;;  %v6877_v27 = vpack.c.bf16 %v7669_v17, %v7676_v1 }
 0x158   : > { %4833 = vmatprep.subr.bf16.mxu1 %v4832_v24  ;;  %v7667_v30 = vand.u32 4294901760, %v6844_v39 }
 0x159   : > { %5215 = vmatpush3.bf16.msra.mxu0 %v5212_v13  ;;  %v6863_v13 = vld [vmem:[%s5661_s28 + $0x1b8] sm:$0xff]  ;;  %7895 = vst [vmem:[#allocation10_spill] sm:$0xff] %v6877_v27 }
 0x15a   : > { %5217 = vmatprep.subr.bf16.mxu0 %v5216_v43 }
 0x15b   : > { %4835 = vmatpush3.bf16.msra.mxu1 %v4832_v24  ;;  %v6882_v24 = vld [vmem:[%s5661_s28 + $0x1c0] sm:$0xff] }
 0x15c   : > { %4837 = vmatprep.subr.bf16.mxu1 %v7810_v28 }
 0x15d   : > { %5219 = vmatpush3.bf16.msra.mxu0 %v5216_v43 }
 0x15e   : > { %4009 = vmatmul.mubr.f32.vlgmr.msra.gmra.mrb[0].mxu1 %v6506_v53  ;;  %5221 = vmatprep.subr.bf16.mxu0 %v7811_v29 }
 0x15f   : > { %4839 = vmatpush3.bf16.msra.mxu1 %v7810_v28  ;;  %4043 = vmatprep.mubr.f32.mxu1 %v6480_v44  ;;  %v324_v44 = vcvt.s32.f32 %v6470_v10 }
 0x160   : > { %4429 = vmatmul.mubr.f32.vlgmr.msra.gmra.mrb[0].mxu0 %v6515_v25  ;;  %4841 = vmatprep.subr.bf16.mxu1 %v7812_v33 }
 0x161   : > { %5223 = vmatpush3.bf16.msra.mxu0 %v7811_v29  ;;  %4463 = vmatprep.mubr.f32.mxu0 %v6486_v45  ;;  %v2579_v45 = vcvt.s32.f32 %v6472_v21  ;;  %v6729_v28 = vand.u32 4294901760, %v324_v44  ;;  %v325_v29 = vcvt.s32.f32 %v6490_v47  ;;  %v6755_v47 = vld [vmem:[%s5661_s28 + $0x180] sm:$0xff] }
 0x162   : > { %5225 = vmatprep.subr.bf16.mxu0 %v7813_v35  ;;  %v2598_v0 = vand.u32 4294901760, %v6755_v47 }
 0x163   : > { %4843 = vmatpush3.bf16.msra.mxu1 %v7812_v33  ;;  %v6733_v10 = vand.u32 4294901760, %v2579_v45  ;;  %v6739_v21 = vsub.f32 %v324_v44, %v6729_v28  ;;  %v2580_v33 = vcvt.s32.f32 %v6500_v7  ;;  %v6760_v7 = vand.u32 4294901760, %v325_v29 }
 0x164   : > { %4845 = vmatprep.subr.bf16.mxu1 %v7814_v31  ;;  %v7671_v44 = vand.u32 4294901760, %v6859_v18 }
 0x165   : > { %5227 = vmatpush3.bf16.msra.mxu0 %v7813_v35  ;;  %v6744_v35 = vld [vmem:[%s5661_s28] sm:$0xff]  ;;  %v6787_v26 = vsub.f32 %v325_v29, %v6760_v7 }
 0x166   : > { %5229 = vmatprep.subr.bf16.mxu0 %v7815_v22 }
 0x167   : > { %4847 = vmatpush3.bf16.msra.mxu1 %v7814_v31  ;;  %v6747_v31 = vld [vmem:[%s5661_s28 + $0x8] sm:$0xff]  ;;  %7889 = vst [vmem:[#allocation4_spill] sm:$0xff] %v6787_v26 }
 0x168   : > { %4849 = vmatprep.subr.bf16.mxu1 %v7816_v42 }
 0x169   : > { %5231 = vmatpush3.bf16.msra.mxu0 %v7815_v22  ;;  %v6751_v22 = vsub.f32 %v2579_v45, %v6733_v10  ;;  %v7670_v45 = vand.u32 4294901760, %v6863_v13 }
 0x16a   : > { %5233 = vmatprep.subr.bf16.mxu0 %v7817_v32 }
 0x16b   : > { %4851 = vmatpush3.bf16.msra.mxu1 %v7816_v42  ;;  %7888 = vst [vmem:[#allocation3_spill] sm:$0xff] %v6751_v22  ;;  %v6758_v42 = vld [vmem:[%s5661_s28 + $0x188] sm:$0xff]  ;;  %v7663_v59 = vand.u32 4294901760, %v6751_v22 }
 0x16c   : > { %4853 = vmatprep.subr.bf16.mxu1 %v7818_v61  ;;  %v2601_v14 = vand.u32 4294901760, %v6758_v42 }
 0x16d   : > { %5235 = vmatpush3.bf16.msra.mxu0 %v7817_v32  ;;  %v1094_v32 = vand.u32 4294901760, %v6744_v35  ;;  %v2681_v49 = vsub.f32 %v6751_v22, %v7663_v59  ;;  %v6932_v59 = vld [vmem:[%s5661_s28 + $0x1d8] sm:$0xff] }
 0x16e   : > { %5237 = vmatprep.subr.bf16.mxu0 %v7819_v51  ;;  %v6816_v38 = vpack.c.bf16 %v2601_v14, %v2598_v0 }
 0x16f   : > { %4855 = vmatpush3.bf16.msra.mxu1 %v7818_v61  ;;  %v1097_v61 = vand.u32 4294901760, %v6747_v31  ;;  %v2682_v37 = vand.u32 4294901760, %v2681_v49  ;;  %v7674_v49 = vand.u32 4294901760, %v6885_v11 }
 0x170   : > { %4857 = vmatprep.subr.bf16.mxu1 %v7820_v19  ;;  %7892 = vst [vmem:[#allocation7_spill] sm:$0xff] %v6816_v38 }
 0x171   : > { %5239 = vmatpush3.bf16.msra.mxu0 %v7819_v51  ;;  %v6765_v51 = vand.u32 4294901760, %v2580_v33  ;;  %v6794_v4 = vpack.c.bf16 %v1097_v61, %v1094_v32 }
 0x172   : > { %5241 = vmatprep.subr.bf16.mxu0 %v7821_v46 }
 0x173   : > { %4859 = vmatpush3.bf16.msra.mxu1 %v7820_v19  ;;  %v7664_v19 = vand.u32 4294901760, %v6739_v21  ;;  %7890 = vst [vmem:[#allocation5_spill] sm:$0xff] %v6794_v4  ;;  %v6799_v2 = vsub.f32 %v2580_v33, %v6765_v51  ;;  %v7672_v33 = vand.u32 4294901760, %v6869_v48 }
 0x174   : > { %4861 = vmatprep.subr.bf16.mxu1 %v7822_v52 }
 0x175   : > { %5243 = vmatpush3.bf16.msra.mxu0 %v7821_v46  ;;  %v6784_v46 = vld [vmem:[%s5661_s28 + $0x198] sm:$0xff]  ;;  %7891 = vst [vmem:[#allocation6_spill] sm:$0xff] %v6799_v2  ;;  %v1177_v15 = vsub.f32 %v6739_v21, %v7664_v19  ;;  %v7661_v63 = vand.u32 4294901760, %v6799_v2  ;;  %v6935_v19 = vld [vmem:[%s5661_s28 + $0x60] sm:$0xff] }
 0x176   : > { %5245 = vmatprep.subr.bf16.mxu0 %v7823_v8 }
 0x177   : > { %4863 = vmatpush3.bf16.msra.mxu1 %v7822_v52  ;;  %v1100_v52 = vand.u32 4294901760, %v6770_v5  ;;  %v1178_v41 = vand.u32 4294901760, %v1177_v15  ;;  %v6908_v43 = vsub.f32 %v6799_v2, %v7661_v63  ;;  %v7675_v15 = vand.u32 4294901760, %v6882_v24 }
 0x178   : > { %4865 = vmatprep.subr.bf16.mxu1 %v7824_v56  ;;  %v7677_v63 = vand.u32 4294901760, %v6898_v34 }
 0x179   : > { %5247 = vmatpush3.bf16.msra.mxu0 %v7823_v8  ;;  %v2607_v8 = vand.u32 4294901760, %v6784_v46  ;;  %v6835_v9 = vpack.c.bf16 %v1103_v20, %v1100_v52  ;;  %v7011_v1 = vsub.f32 %v6770_v5, %v1100_v52  ;;  %v7028_v5 = vld [vmem:[%s5661_s28 + $0x1f8] sm:$0xff] }
 0x17a   : > { %5249 = vmatprep.subr.bf16.mxu0 %v7827_v23 }
 0x17b   : > { %4867 = vmatpush3.bf16.msra.mxu1 %v7824_v56  ;;  %7893 = vst [vmem:[#allocation8_spill] sm:$0xff] %v6835_v9  ;;  %v7662_v56 = vand.u32 4294901760, %v6787_v26 }
 0x17c   : > { %4869 = vmatprep.subr.bf16.mxu1 %v6794_v4 }
 0x17d   : > { %5251 = vmatpush3.bf16.msra.mxu0 %v7827_v23  ;;  %v6856_v23 = vpack.c.bf16 %v2607_v8, %v2604_v58  ;;  %v6903_v3 = vsub.f32 %v6787_v26, %v7662_v56  ;;  %v6928_v56 = vld [vmem:[%s5661_s28 + $0x1d0] sm:$0xff] }
 0x17e   : > { %4044 = vmatmul.mubr.f32.vlgmr.msra.gmra.mrb[0].mxu1 %v6506_v53  ;;  %5253 = vmatprep.subr.bf16.mxu0 %v6816_v38  ;;  %v6866_v53 = vld [vmem:[%s5661_s28 + $0x40] sm:$0xff] }
 0x17f   : > { %7894 = vst [vmem:[#allocation9_spill] sm:$0xff] %v6856_v23  ;;  %4871 = vmatpush3.bf16.msra.mxu1 %v6794_v4  ;;  %4078 = vmatprep.mubr.f32.mxu1 %v1178_v41  ;;  %v7673_v29 = vand.u32 4294901760, %v6866_v53  ;;  %v6923_v41 = vpack.c.bf16 %v7666_v36, %v7667_v30  ;;  %v6943_v36 = vsub.f32 %v6744_v35, %v1094_v32  ;;  %v6964_v35 = vld [vmem:[%s5661_s28 + $0x1e0] sm:$0xff] }
 0x180   : > { %4464 = vmatmul.mubr.f32.vlgmr.msra.gmra.mrb[0].mxu0 %v6515_v25  ;;  %4873 = vmatprep.subr.bf16.mxu1 %v6835_v9  ;;  %v6892_v25 = vpack.c.bf16 %v7665_v6, %v7668_v12  ;;  %v6938_v6 = vld [vmem:[%s5661_s28 + $0x68] sm:$0xff]  ;;  %v6948_v30 = vsub.f32 %v6747_v31, %v1097_v61  ;;  %v6955_v12 = vpack.c.bf16 %v7670_v45, %v7671_v44  ;;  %v7680_v45 = vand.u32 4294901760, %v6928_v56 }
 0x181   : > { %5255 = vmatpush3.bf16.msra.mxu0 %v6816_v38  ;;  %4498 = vmatprep.mubr.f32.mxu0 %v2682_v37  ;;  %7897 = vst [vmem:[#allocation12_spill] sm:$0xff] %v6923_v41  ;;  %v7678_v37 = vand.u32 4294901760, %v6895_v54  ;;  %v6961_v17 = vpack.c.bf16 %v7672_v33, %v7673_v29  ;;  %v6973_v61 = vpack.c.bf16 %v7674_v49, %v7675_v15  ;;  %v6977_v44 = vld [vmem:[%s5661_s28 + $0x1e8] sm:$0xff]  ;;  %v6980_v33 = vld [vmem:[%s5661_s28 + $0x70] sm:$0xff]  ;;  %v6983_v29 = vld [vmem:[%s5661_s28 + $0x78] sm:$0xff]  ;;  %v7679_v15 = vand.u32 4294901760, %v6932_v59 }
 0x182   : > { %7896 = vst [vmem:[#allocation11_spill] sm:$0xff] %v6892_v25  ;;  %5257 = vmatprep.subr.bf16.mxu0 %v6856_v23  ;;  %7898 = vst [vmem:[#allocation13_spill] sm:$0xff] %v6955_v12  ;;  %v6988_v31 = vsub.f32 %v6755_v47, %v2598_v0  ;;  %v6993_v32 = vsub.f32 %v6758_v42, %v2601_v14  ;;  %v7025_v47 = vld [vmem:[%s5661_s28 + $0x1f0] sm:$0xff]  ;;  %v7040_v42 = vsub.f32 %v6784_v46, %v2607_v8 }
 0x183   : > { %4875 = vmatpush3.bf16.msra.mxu1 %v6835_v9  ;;  %7899 = vst [vmem:[#allocation14_spill] sm:$0xff] %v6961_v17  ;;  %7900 = vst [vmem:[#allocation15_spill] sm:$0xff] %v6973_v61  ;;  %v7000_v49 = vpack.c.bf16 %v7677_v63, %v7678_v37  ;;  %v7016_v63 = vsub.f32 %v6773_v50, %v1103_v20  ;;  %v7035_v20 = vsub.f32 %v6781_v60, %v2604_v58 }
 0x184   : > { %4877 = vmatprep.subr.bf16.mxu1 %v6877_v27  ;;  %v7047_v14 = vpack.c.bf16 %v7679_v15, %v7680_v45  ;;  %v7903_v50 = vand.u32 4294901760, %v6935_v19  ;;  %v7904_v52 = vand.u32 4294901760, %v6938_v6  ;;  %v7906_v60 = vand.u32 4294901760, %v6806_v16 }
 0x185   : > { %5259 = vmatpush3.bf16.msra.mxu0 %v6856_v23  ;;  %7901 = vst [vmem:[#allocation17_spill] sm:$0xff] %v7000_v49  ;;  %v7907_v46 = vand.u32 4294901760, %v6809_v40  ;;  %v7908_v15 = vand.u32 4294901760, %v6943_v36  ;;  %v7909_v37 = vand.u32 4294901760, %v6948_v30 }
 0x186   : > { %5261 = vmatprep.subr.bf16.mxu0 %v6892_v25  ;;  %7902 = vst [vmem:[#allocation19_spill] sm:$0xff] %v7047_v14  ;;  %v7053_v0 = vpack.c.bf16 %v7904_v52, %v7903_v50  ;;  %v7058_v58 = vsub.f32 %v6806_v16, %v7906_v60  ;;  %v7910_v60 = vand.u32 4294901760, %v6964_v35  ;;  %v7916_v16 = vand.u32 4294901760, %v6988_v31 }
 0x187   : > { %4879 = vmatpush3.bf16.msra.mxu1 %v6877_v27  ;;  %v7063_v8 = vsub.f32 %v6809_v40, %v7907_v46  ;;  %v1198_v45 = vsub.f32 %v6943_v36, %v7908_v15  ;;  %v1205_v52 = vsub.f32 %v6948_v30, %v7909_v37  ;;  %v7911_v40 = vand.u32 4294901760, %v6977_v44 }
 0x188   : > { %4881 = vmatprep.subr.bf16.mxu1 %v6923_v41  ;;  %7905 = vst [vmem:[#allocation22_spill] sm:$0xff] %v7053_v0  ;;  %v7914_v15 = vand.u32 4294901760, %v6983_v29  ;;  %v7917_v27 = vand.u32 4294901760, %v6993_v32  ;;  %v7918_v50 = vand.u32 4294901760, %v6821_v57 }
 0x189   : > { %5263 = vmatpush3.bf16.msra.mxu0 %v6892_v25  ;;  %v7079_v46 = vpack.c.bf16 %v7911_v40, %v7910_v60  ;;  %v2702_v25 = vsub.f32 %v6988_v31, %v7916_v16  ;;  %v7919_v16 = vand.u32 4294901760, %v6824_v62  ;;  %v1206_v23 = vand.u32 4294901760, %v1205_v52 }
 0x18a   : > { %5265 = vmatprep.subr.bf16.mxu0 %v6955_v12  ;;  %v2709_v60 = vsub.f32 %v6993_v32, %v7917_v27  ;;  %v7104_v37 = vsub.f32 %v6821_v57, %v7918_v50  ;;  %v1199_v27 = vand.u32 4294901760, %v1198_v45  ;;  %v7920_v40 = vand.u32 4294901760, %v7011_v1 }
 0x18b   : > { %4883 = vmatpush3.bf16.msra.mxu1 %v6923_v41  ;;  %7912 = vst [vmem:[#allocation16_spill] sm:$0xff] %v7079_v46  ;;  %v7922_v57 = vand.u32 4294901760, %v6844_v39  ;;  %v7924_v52 = vand.u32 4294901760, %v6859_v18 }
 0x18c   : > { %4885 = vmatprep.subr.bf16.mxu1 %v6961_v17  ;;  %v2710_v38 = vand.u32 4294901760, %v2709_v60 }
 0x18d   : > { %5267 = vmatpush3.bf16.msra.mxu0 %v6955_v12  ;;  %v7913_v12 = vand.u32 4294901760, %v6980_v33  ;;  %v7122_v50 = vsub.f32 %v6844_v39, %v7922_v57  ;;  %v7926_v39 = vand.u32 4294901760, %v7025_v47  ;;  %v7927_v57 = vand.u32 4294901760, %v7028_v5 }
 0x18e   : > { %5269 = vmatprep.subr.bf16.mxu0 %v6973_v61 }
 0x18f   : > { %v7085_v41 = vpack.c.bf16 %v7914_v15, %v7913_v12  ;;  %4887 = vmatpush3.bf16.msra.mxu1 %v6961_v17  ;;  %v7109_v17 = vsub.f32 %v6824_v62, %v7919_v16  ;;  %v1212_v12 = vsub.f32 %v7011_v1, %v7920_v40  ;;  %v7921_v15 = vand.u32 4294901760, %v7016_v63 }
 0x190   : > { %4889 = vmatprep.subr.bf16.mxu1 %v7000_v49  ;;  %v7923_v62 = vand.u32 4294901760, %v6847_v55  ;;  %v7132_v40 = vsub.f32 %v6859_v18, %v7924_v52  ;;  %v7925_v16 = vand.u32 4294901760, %v6863_v13  ;;  %v7929_v18 = vand.u32 4294901760, %v7040_v42 }
 0x191   : > { %7915 = vst [vmem:[#allocation18_spill] sm:$0xff] %v7085_v41  ;;  %5271 = vmatpush3.bf16.msra.mxu0 %v6973_v61  ;;  %v1219_v9 = vsub.f32 %v7016_v63, %v7921_v15  ;;  %v7144_v61 = vpack.c.bf16 %v7927_v57, %v7926_v39  ;;  %v1213_v26 = vand.u32 4294901760, %v1212_v12  ;;  %v7711_v4 = vand.u32 4294901760, %v7122_v50 }
 0x192   : > { %5273 = vmatprep.subr.bf16.mxu0 %v7047_v14  ;;  %v7127_v45 = vsub.f32 %v6847_v55, %v7923_v62  ;;  %v7137_v15 = vsub.f32 %v6863_v13, %v7925_v16  ;;  %v2703_v55 = vand.u32 4294901760, %v2702_v25  ;;  %v7928_v62 = vand.u32 4294901760, %v7035_v20 }
 0x193   : > { %4891 = vmatpush3.bf16.msra.mxu1 %v7000_v49  ;;  %v2723_v52 = vsub.f32 %v7040_v42, %v7929_v18  ;;  %v7930_v13 = vand.u32 4294901760, %v7058_v58  ;;  %v7931_v49 = vand.u32 4294901760, %v7063_v8  ;;  %v1220_v18 = vand.u32 4294901760, %v1219_v9 }
 0x194   : > { %v2716_v2 = vsub.f32 %v7035_v20, %v7928_v62  ;;  %4893 = vmatprep.subr.bf16.mxu1 %v7053_v0  ;;  %v4900_v62 = vpack.c.bf16 %v1206_v23, %v1199_v27  ;;  %v7933_v9 = vand.u32 4294901760, %v6869_v48 }
 0x195   : > { %v1226_v16 = vsub.f32 %v7058_v58, %v7930_v13  ;;  %v1233_v39 = vsub.f32 %v7063_v8, %v7931_v49  ;;  %5275 = vmatpush3.bf16.msra.mxu0 %v7047_v14  ;;  %v2724_v57 = vand.u32 4294901760, %v2723_v52  ;;  %v7932_v14 = vand.u32 4294901760, %v6866_v53 }
 0x196   : > { %5277 = vmatprep.subr.bf16.mxu0 %v7079_v46  ;;  %v2717_v25 = vand.u32 4294901760, %v2716_v2  ;;  %v7176_v60 = vsub.f32 %v6869_v48, %v7933_v9  ;;  %v7934_v49 = vand.u32 4294901760, %v7104_v37  ;;  %v7935_v2 = vand.u32 4294901760, %v7109_v17 }
 0x197   : > { %4895 = vmatpush3.bf16.msra.mxu1 %v7053_v0  ;;  %v7171_v23 = vsub.f32 %v6866_v53, %v7932_v14  ;;  %v1227_v12 = vand.u32 4294901760, %v1226_v16  ;;  %v1234_v27 = vand.u32 4294901760, %v1233_v39  ;;  %v5284_v53 = vpack.c.bf16 %v2710_v38, %v2703_v55 }
 0x198   : > { %4897 = vmatprep.subr.bf16.mxu1 %v7085_v41  ;;  %v2730_v22 = vsub.f32 %v7104_v37, %v7934_v49  ;;  %v2737_v52 = vsub.f32 %v7109_v17, %v7935_v2  ;;  %v4904_v14 = vpack.c.bf16 %v1220_v18, %v1213_v26  ;;  %v7936_v13 = vand.u32 4294901760, %v6882_v24 }
 0x199   : > { %5279 = vmatpush3.bf16.msra.mxu0 %v7079_v46  ;;  %v7937_v16 = vand.u32 4294901760, %v6885_v11  ;;  %v1240_v49 = vsub.f32 %v7122_v50, %v7711_v4  ;;  %v7938_v9 = vand.u32 4294901760, %v7127_v45  ;;  %v7939_v38 = vand.u32 4294901760, %v7132_v40 }
 0x19a   : > { %v7189_v48 = vsub.f32 %v6882_v24, %v7936_v13  ;;  %5281 = vmatprep.subr.bf16.mxu0 %v7144_v61  ;;  %v7940_v55 = vand.u32 4294901760, %v7137_v15  ;;  %v7941_v2 = vand.u32 4294901760, %v6895_v54  ;;  %v4908_v46 = vpack.c.bf16 %v1234_v27, %v1227_v12 }
 0x19b   : > { %v7194_v39 = vsub.f32 %v6885_v11, %v7937_v16  ;;  %v1247_v26 = vsub.f32 %v7127_v45, %v7938_v9  ;;  %v2744_v24 = vsub.f32 %v7132_v40, %v7939_v38  ;;  %4899 = vmatpush3.bf16.msra.mxu1 %v7085_v41  ;;  %v7942_v9 = vand.u32 4294901760, %v6898_v34 }
 0x19c   : > { %v2751_v18 = vsub.f32 %v7137_v15, %v7940_v55  ;;  %v7215_v16 = vsub.f32 %v6895_v54, %v7941_v2  ;;  %4901 = vmatprep.subr.bf16.mxu1 %v4900_v62  ;;  %v5288_v38 = vpack.c.bf16 %v2724_v57, %v2717_v25  ;;  %v2731_v55 = vand.u32 4294901760, %v2730_v22 }
 0x19d   : > { %v7220_v4 = vsub.f32 %v6898_v34, %v7942_v9  ;;  %v2738_v0 = vand.u32 4294901760, %v2737_v52  ;;  %5283 = vmatpush3.bf16.msra.mxu0 %v7144_v61  ;;  %v2757_v11 = vand.u32 4294901760, %v7189_v48  ;;  %v7718_v13 = vand.u32 4294901760, %v7194_v39 }
 0x19e   : > { %v7943_v41 = vand.u32 4294901760, %v6928_v56  ;;  %v7944_v2 = vand.u32 4294901760, %v6932_v59  ;;  %v7945_v25 = vand.u32 4294901760, %v6903_v3  ;;  %5285 = vmatprep.subr.bf16.mxu0 %v5284_v53  ;;  %v1241_v22 = vand.u32 4294901760, %v1240_v49 }
 0x19f   : > { %v1248_v57 = vand.u32 4294901760, %v1247_v26  ;;  %v2745_v12 = vand.u32 4294901760, %v2744_v24  ;;  %v2752_v27 = vand.u32 4294901760, %v2751_v18  ;;  %v7946_v52 = vand.u32 4294901760, %v7171_v23 }
 0x1a0   : > { %v7228_v54 = vsub.f32 %v6928_v56, %v7943_v41  ;;  %v7233_v34 = vsub.f32 %v6932_v59, %v7944_v2  ;;  %4079 = vmatmul.mubr.f32.vlgmr.msra.gmra.mrb[0].mxu1 %v7945_v25  ;;  %v7947_v41 = vand.u32 4294901760, %v7176_v60  ;;  %v7722_v9 = vand.u32 4294901760, %v7215_v16 }
 0x1a1   : > { %4903 = vmatpush3.bf16.msra.mxu1 %v4900_v62  ;;  %4113 = vmatprep.mubr.f32.mxu1 %v6729_v28  ;;  %v1254_v56 = vsub.f32 %v7171_v23, %v7946_v52  ;;  %v7719_v3 = vand.u32 4294901760, %v7220_v4  ;;  %v7948_v49 = vand.u32 4294901760, %v6908_v43  ;;  %v5292_v26 = vpack.c.bf16 %v2738_v0, %v2731_v55 }
 0x1a2   : > { %v1261_v59 = vsub.f32 %v7176_v60, %v7947_v41  ;;  %4905 = vmatprep.subr.bf16.mxu1 %v4904_v14  ;;  %v7949_v62 = vand.u32 4294901760, %v6935_v19  ;;  %v7950_v18 = vand.u32 4294901760, %v6938_v6  ;;  %v2758_v43 = vsub.f32 %v7189_v48, %v2757_v11 }
 0x1a3   : > { %4499 = vmatmul.mubr.f32.vlgmr.msra.gmra.mrb[0].mxu0 %v7948_v49  ;;  %v2765_v0 = vsub.f32 %v7194_v39, %v7718_v13  ;;  %v7720_v55 = vand.u32 4294901760, %v7228_v54  ;;  %v4912_v25 = vpack.c.bf16 %v1248_v57, %v1241_v22  ;;  %v5296_v52 = vpack.c.bf16 %v2752_v27, %v2745_v12 }
 0x1a4   : > { %v7251_v24 = vsub.f32 %v6935_v19, %v7949_v62  ;;  %v7256_v2 = vsub.f32 %v6938_v6, %v7950_v18  ;;  %5287 = vmatpush3.bf16.msra.mxu0 %v5284_v53  ;;  %4533 = vmatprep.mubr.f32.mxu0 %v6733_v10  ;;  %v7721_v19 = vand.u32 4294901760, %v7233_v34  ;;  %v7951_v6 = vand.u32 4294901760, %v6964_v35 }
 0x1a5   : > { %5289 = vmatprep.subr.bf16.mxu0 %v5288_v38  ;;  %v7952_v41 = vand.u32 4294901760, %v6977_v44  ;;  %4907 = vmatpush3.bf16.msra.mxu1 %v4904_v14  ;;  %v1255_v62 = vand.u32 4294901760, %v1254_v56  ;;  %v1262_v18 = vand.u32 4294901760, %v1261_v59  ;;  %v1268_v13 = vsub.f32 %v7215_v16, %v7722_v9 }
 0x1a6   : > { %v7270_v53 = vsub.f32 %v6964_v35, %v7951_v6  ;;  %v1275_v22 = vsub.f32 %v7220_v4, %v7719_v3  ;;  %4909 = vmatprep.subr.bf16.mxu1 %v4908_v46  ;;  %v1281_v35 = vand.u32 4294901760, %v7251_v24  ;;  %v7723_v57 = vand.u32 4294901760, %v7256_v2 }
 0x1a7   : > { %v7275_v49 = vsub.f32 %v6977_v44, %v7952_v41  ;;  %v7953_v12 = vand.u32 4294901760, %v6980_v33  ;;  %v7954_v14 = vand.u32 4294901760, %v6983_v29  ;;  %v2759_v56 = vand.u32 4294901760, %v2758_v43 }
 0x1a8   : > { %5291 = vmatpush3.bf16.msra.mxu0 %v5288_v38  ;;  %v2766_v59 = vand.u32 4294901760, %v2765_v0  ;;  %v2772_v6 = vsub.f32 %v7228_v54, %v7720_v55  ;;  %v2779_v41 = vsub.f32 %v7233_v34, %v7721_v19  ;;  %v7955_v3 = vand.u32 4294901760, %v7025_v47 }
 0x1a9   : > { %v7288_v44 = vsub.f32 %v6980_v33, %v7953_v12  ;;  %v7293_v27 = vsub.f32 %v6983_v29, %v7954_v14  ;;  %5293 = vmatprep.subr.bf16.mxu0 %v5292_v26  ;;  %v7725_v33 = vand.u32 4294901760, %v7270_v53  ;;  %v7724_v12 = vand.u32 4294901760, %v7275_v49  ;;  %4911 = vmatpush3.bf16.msra.mxu1 %v4908_v46 }
 0x1aa   : > { %v7306_v29 = vsub.f32 %v7025_v47, %v7955_v3  ;;  %v7956_v38 = vand.u32 4294901760, %v7028_v5  ;;  %v4916_v0 = vpack.c.bf16 %v1262_v18, %v1255_v62  ;;  %v1269_v14 = vand.u32 4294901760, %v1268_v13  ;;  %4913 = vmatprep.subr.bf16.mxu1 %v4912_v25 }
 0x1ab   : > { %v1276_v55 = vand.u32 4294901760, %v1275_v22  ;;  %v1282_v19 = vsub.f32 %v7251_v24, %v1281_v35  ;;  %v1289_v9 = vsub.f32 %v7256_v2, %v7723_v57  ;;  %v7729_v47 = vand.u32 4294901760, %v7288_v44 }
 0x1ac   : > { %v7311_v43 = vsub.f32 %v7028_v5, %v7956_v38  ;;  %v7728_v3 = vand.u32 4294901760, %v7293_v27  ;;  %5295 = vmatpush3.bf16.msra.mxu0 %v5292_v26  ;;  %v5300_v5 = vpack.c.bf16 %v2766_v59, %v2759_v56  ;;  %v2773_v38 = vand.u32 4294901760, %v2772_v6 }
 0x1ad   : > { %v2780_v46 = vand.u32 4294901760, %v2779_v41  ;;  %5297 = vmatprep.subr.bf16.mxu0 %v5296_v52  ;;  %v2786_v13 = vsub.f32 %v7270_v53, %v7725_v33  ;;  %v2793_v62 = vsub.f32 %v7275_v49, %v7724_v12  ;;  %v7727_v18 = vand.u32 4294901760, %v7306_v29  ;;  %4915 = vmatpush3.bf16.msra.mxu1 %v4912_v25 }
 0x1ae   : > { %v7726_v22 = vand.u32 4294901760, %v7311_v43  ;;  %v4920_v57 = vpack.c.bf16 %v1276_v55, %v1269_v14  ;;  %4917 = vmatprep.subr.bf16.mxu1 %v4916_v0  ;;  %v1283_v26 = vand.u32 4294901760, %v1282_v19  ;;  %v1290_v56 = vand.u32 4294901760, %v1289_v9 }
 0x1af   : > { %v1296_v59 = vsub.f32 %v7288_v44, %v7729_v47  ;;  %v1303_v6 = vsub.f32 %v7293_v27, %v7728_v3  ;;  %v5304_v41 = vpack.c.bf16 %v2780_v46, %v2773_v38  ;;  %v2787_v12 = vand.u32 4294901760, %v2786_v13 }
 0x1b0   : > { %5299 = vmatpush3.bf16.msra.mxu0 %v5296_v52  ;;  %v2794_v33 = vand.u32 4294901760, %v2793_v62  ;;  %v2800_v55 = vsub.f32 %v7306_v29, %v7727_v18  ;;  %v2807_v9 = vsub.f32 %v7311_v43, %v7726_v22  ;;  %v4924_v19 = vpack.c.bf16 %v1290_v56, %v1283_v26  ;;  %v7957_v26 = vld [vmem:[#allocation3_spill] sm:$0xff] }
 0x1b1   : > { %5301 = vmatprep.subr.bf16.mxu0 %v5300_v5  ;;  %4919 = vmatpush3.bf16.msra.mxu1 %v4916_v0  ;;  %v1297_v25 = vand.u32 4294901760, %v1296_v59  ;;  %v1304_v14 = vand.u32 4294901760, %v1303_v6  ;;  %v4932_v0 = vpack.c.bf16 %v6948_v30, %v6943_v36  ;;  %v5324_v56 = vpack.c.bf16 %v7109_v17, %v7104_v37 }
 0x1b2   : > { %4921 = vmatprep.subr.bf16.mxu1 %v4920_v57  ;;  %v5308_v52 = vpack.c.bf16 %v2794_v33, %v2787_v12  ;;  %v2801_v38 = vand.u32 4294901760, %v2800_v55  ;;  %v2808_v46 = vand.u32 4294901760, %v2807_v9  ;;  %v5320_v33 = vpack.c.bf16 %v7040_v42, %v7035_v20 }
 0x1b3   : > { %v4928_v13 = vpack.c.bf16 %v1304_v14, %v1297_v25  ;;  %v4940_v12 = vpack.c.bf16 %v7063_v8, %v7058_v58  ;;  %v4944_v59 = vpack.c.bf16 %v7127_v45, %v7122_v50  ;;  %v5328_v6 = vpack.c.bf16 %v7137_v15, %v7132_v40 }
 0x1b4   : > { %5303 = vmatpush3.bf16.msra.mxu0 %v5300_v5  ;;  %v5312_v62 = vpack.c.bf16 %v2808_v46, %v2801_v38  ;;  %v5316_v5 = vpack.c.bf16 %v6993_v32, %v6988_v31  ;;  %v5332_v55 = vpack.c.bf16 %v7194_v39, %v7189_v48  ;;  %v4952_v9 = vpack.c.bf16 %v7220_v4, %v7215_v16  ;;  %v7958_v46 = vld [vmem:[#allocation5_spill] sm:$0xff] }
 0x1b5   : > { %5305 = vmatprep.subr.bf16.mxu0 %v5304_v41  ;;  %4923 = vmatpush3.bf16.msra.mxu1 %v4920_v57  ;;  %v4936_v57 = vpack.c.bf16 %v7016_v63, %v7011_v1  ;;  %v4956_v25 = vpack.c.bf16 %v7256_v2, %v7251_v24  ;;  %v5340_v14 = vpack.c.bf16 %v7275_v49, %v7270_v53  ;;  %v7980_v22 = vand.u32 4294901760, %v6993_v32 }
 0x1b6   : > { %4925 = vmatprep.subr.bf16.mxu1 %v4924_v19  ;;  %v5344_v38 = vpack.c.bf16 %v7311_v43, %v7306_v29  ;;  %v7981_v3 = vand.u32 4294901760, %v7011_v1  ;;  %v7982_v47 = vand.u32 4294901760, %v7016_v63  ;;  %v7987_v1 = vand.u32 4294901760, %v7058_v58 }
 0x1b7   : > { %v7988_v63 = vand.u32 4294901760, %v7063_v8  ;;  %v7993_v58 = vand.u32 4294901760, %v7132_v40  ;;  %v7994_v8 = vand.u32 4294901760, %v7137_v15  ;;  %v7998_v40 = vand.u32 4294901760, %v7215_v16 }
 0x1b8   : > { %5307 = vmatpush3.bf16.msra.mxu0 %v5304_v41  ;;  %v4948_v41 = vpack.c.bf16 %v7176_v60, %v7171_v23  ;;  %v7999_v15 = vand.u32 4294901760, %v7220_v4  ;;  %v8002_v48 = vand.u32 4294901760, %v7256_v2  ;;  %v8004_v4 = vand.u32 4294901760, %v7275_v49  ;;  %v3284_v49 = vld [vmem:[#allocation2 + $0x8] sm:$0xff] }
 0x1b9   : > { %5309 = vmatprep.subr.bf16.mxu0 %v5308_v52  ;;  %4927 = vmatpush3.bf16.msra.mxu1 %v4924_v19  ;;  %v5336_v19 = vpack.c.bf16 %v7233_v34, %v7228_v54  ;;  %v8007_v24 = vand.u32 4294901760, %v7306_v29  ;;  %v8008_v2 = vand.u32 4294901760, %v7311_v43  ;;  %v3283_v29 = vld [vmem:[#allocation2] sm:$0xff] }
 0x1ba   : > { %4929 = vmatprep.subr.bf16.mxu1 %v4928_v13 }
 0x1bc   : > { %5311 = vmatpush3.bf16.msra.mxu0 %v5308_v52  ;;  %v4960_v52 = vpack.c.bf16 %v7293_v27, %v7288_v44 }
 0x1bd   : > { %5313 = vmatprep.subr.bf16.mxu0 %v5312_v62  ;;  %4931 = vmatpush3.bf16.msra.mxu1 %v4928_v13  ;;  %v7959_v13 = vld [vmem:[#allocation4_spill] sm:$0xff] }
 0x1be   : > { %4933 = vmatprep.subr.bf16.mxu1 %v4932_v0 }
 0x1c0   : > { %5315 = vmatpush3.bf16.msra.mxu0 %v5312_v62  ;;  %4114 = vmatmul.mubr.f32.vlgmr.msra.gmra.mrb[0].mxu1 %v6760_v7  ;;  %v7960_v62 = vld [vmem:[#allocation7_spill] sm:$0xff] }
 0x1c1   : > { %5317 = vmatprep.subr.bf16.mxu0 %v5316_v5  ;;  %4935 = vmatpush3.bf16.msra.mxu1 %v4932_v0  ;;  %v7961_v0 = vand.u32 4294901760, %v6739_v21 }
 0x1c2   : > { %4148 = vmatprep.mubr.f32.mxu1 %v6739_v21  ;;  %4937 = vmatprep.subr.bf16.mxu1 %v4936_v57  ;;  %v7968_v21 = vld [vmem:[#allocation12_spill] sm:$0xff] }
 0x1c3   : > { %4534 = vmatmul.mubr.f32.vlgmr.msra.gmra.mrb[0].mxu0 %v6765_v51 }
 0x1c4   : > { %5319 = vmatpush3.bf16.msra.mxu0 %v5316_v5  ;;  %4568 = vmatprep.mubr.f32.mxu0 %v7957_v26  ;;  %v7962_v5 = vld [vmem:[#allocation6_spill] sm:$0xff] }
 0x1c5   : > { %5321 = vmatprep.subr.bf16.mxu0 %v5320_v33  ;;  %4939 = vmatpush3.bf16.msra.mxu1 %v4936_v57  ;;  %v7963_v57 = vld [vmem:[#allocation8_spill] sm:$0xff] }
 0x1c6   : > { %4941 = vmatprep.subr.bf16.mxu1 %v4940_v12 }
 0x1c8   : > { %5323 = vmatpush3.bf16.msra.mxu0 %v5320_v33  ;;  %v7964_v33 = vand.u32 4294901760, %v7957_v26  ;;  %v7970_v26 = vld [vmem:[#allocation14_spill] sm:$0xff] }
 0x1c9   : > { %5325 = vmatprep.subr.bf16.mxu0 %v5324_v56  ;;  %4943 = vmatpush3.bf16.msra.mxu1 %v4940_v12  ;;  %v7965_v12 = vld [vmem:[#allocation9_spill] sm:$0xff] }
 0x1ca   : > { %4945 = vmatprep.subr.bf16.mxu1 %v4944_v59 }
 0x1cc   : > { %5327 = vmatpush3.bf16.msra.mxu0 %v5324_v56  ;;  %v7966_v56 = vld [vmem:[#allocation10_spill] sm:$0xff] }
 0x1cd   : > { %5329 = vmatprep.subr.bf16.mxu0 %v5328_v6  ;;  %4947 = vmatpush3.bf16.msra.mxu1 %v4944_v59  ;;  %v7967_v59 = vld [vmem:[#allocation11_spill] sm:$0xff] }
 0x1ce   : > { %4949 = vmatprep.subr.bf16.mxu1 %v4948_v41 }
 0x1d0   : > { %5331 = vmatpush3.bf16.msra.mxu0 %v5328_v6  ;;  %v7969_v6 = vld [vmem:[#allocation13_spill] sm:$0xff] }
 0x1d1   : > { %5333 = vmatprep.subr.bf16.mxu0 %v5332_v55  ;;  %4951 = vmatpush3.bf16.msra.mxu1 %v4948_v41  ;;  %v7971_v41 = vld [vmem:[#allocation15_spill] sm:$0xff] }
 0x1d2   : > { %4953 = vmatprep.subr.bf16.mxu1 %v4952_v9 }
 0x1d4   : > { %5335 = vmatpush3.bf16.msra.mxu0 %v5332_v55  ;;  %v7972_v55 = vld [vmem:[#allocation17_spill] sm:$0xff] }
 0x1d5   : > { %5337 = vmatprep.subr.bf16.mxu0 %v5336_v19  ;;  %4955 = vmatpush3.bf16.msra.mxu1 %v4952_v9  ;;  %v7973_v9 = vld [vmem:[#allocation19_spill] sm:$0xff] }
 0x1d6   : > { %4957 = vmatprep.subr.bf16.mxu1 %v4956_v25 }
 0x1d8   : > { %5339 = vmatpush3.bf16.msra.mxu0 %v5336_v19  ;;  %v7974_v19 = vld [vmem:[#allocation22_spill] sm:$0xff] }
 0x1d9   : > { %5341 = vmatprep.subr.bf16.mxu0 %v5340_v14  ;;  %4959 = vmatpush3.bf16.msra.mxu1 %v4956_v25  ;;  %v7975_v25 = vld [vmem:[#allocation16_spill] sm:$0xff] }
 0x1da   : > { %4961 = vmatprep.subr.bf16.mxu1 %v4960_v52 }
 0x1dc   : > { %5343 = vmatpush3.bf16.msra.mxu0 %v5340_v14  ;;  %v7976_v14 = vld [vmem:[#allocation18_spill] sm:$0xff] }
 0x1dd   : > { %5345 = vmatprep.subr.bf16.mxu0 %v5344_v38  ;;  %4963 = vmatpush3.bf16.msra.mxu1 %v4960_v52  ;;  %v7977_v52 = vand.u32 4294901760, %v6943_v36  ;;  %v5000_v36 = vpack.c.bf16 %v7982_v47, %v7981_v3  ;;  %v5004_v47 = vpack.c.bf16 %v7988_v63, %v7987_v1 }
 0x1de   : > { %4965 = vmatprep.subr.bf16.mxu1 %v7958_v46 }
 0x1e0   : > { %5347 = vmatpush3.bf16.msra.mxu0 %v5344_v38  ;;  %4149 = vmatmul.mubr.f32.vlgmr.msra.gmra.mrb[0].mxu1 %v7959_v13  ;;  %v7978_v38 = vand.u32 4294901760, %v6948_v30  ;;  %v7983_v30 = vand.u32 4294901760, %v7959_v13  ;;  %v7991_v13 = vand.u32 4294901760, %v7122_v50  ;;  %v7997_v50 = vand.u32 4294901760, %v7194_v39 }
 0x1e1   : > { %5349 = vmatprep.subr.bf16.mxu0 %v7960_v62  ;;  %4967 = vmatpush3.bf16.msra.mxu1 %v7958_v46  ;;  %v5020_v39 = vpack.c.bf16 %v8002_v48, %v1281_v35  ;;  %v5408_v35 = vpack.c.bf16 %v8008_v2, %v8007_v24 }
 0x1e2   : > { %4183 = vmatprep.mubr.f32.mxu1 %v7961_v0  ;;  %4969 = vmatprep.subr.bf16.mxu1 %v7963_v57  ;;  %v4996_v0 = vpack.c.bf16 %v7978_v38, %v7977_v52  ;;  %v7984_v52 = vand.u32 4294901760, %v7035_v20  ;;  %v7989_v20 = vand.u32 4294901760, %v7104_v37  ;;  %v7995_v37 = vand.u32 4294901760, %v7171_v23 }
 0x1e3   : > { %4569 = vmatmul.mubr.f32.vlgmr.msra.gmra.mrb[0].mxu0 %v7962_v5  ;;  %v8000_v23 = vand.u32 4294901760, %v7228_v54  ;;  %v8005_v54 = vand.u32 4294901760, %v7288_v44 }
 0x1e4   : > { %5351 = vmatpush3.bf16.msra.mxu0 %v7960_v62  ;;  %4603 = vmatprep.mubr.f32.mxu0 %v7964_v33  ;;  %v7979_v33 = vand.u32 4294901760, %v6988_v31  ;;  %v7985_v31 = vand.u32 4294901760, %v7040_v42  ;;  %v7990_v42 = vand.u32 4294901760, %v7109_v17  ;;  %v7996_v17 = vand.u32 4294901760, %v7176_v60 }
 0x1e5   : > { %5353 = vmatprep.subr.bf16.mxu0 %v7965_v12  ;;  %4971 = vmatpush3.bf16.msra.mxu1 %v7963_v57  ;;  %v8001_v60 = vand.u32 4294901760, %v7233_v34  ;;  %v8006_v34 = vand.u32 4294901760, %v7293_v27 }
 0x1e6   : > { %4973 = vmatprep.subr.bf16.mxu1 %v7966_v56  ;;  %v5380_v18 = vpack.c.bf16 %v7980_v22, %v7979_v33  ;;  %v5384_v32 = vpack.c.bf16 %v7985_v31, %v7984_v52  ;;  %v7986_v22 = vand.u32 4294901760, %v7962_v5  ;;  %v5388_v3 = vpack.c.bf16 %v7990_v42, %v7989_v20 }
 0x1e7   : > { %v7992_v5 = vand.u32 4294901760, %v7127_v45  ;;  %v5396_v45 = vpack.c.bf16 %v7997_v50, %v2757_v11  ;;  %v5016_v33 = vpack.c.bf16 %v7999_v15, %v7998_v40  ;;  %v8003_v11 = vand.u32 4294901760, %v7270_v53 }
 0x1e8   : > { %5355 = vmatpush3.bf16.msra.mxu0 %v7965_v12 }
 0x1e9   : > { %5357 = vmatprep.subr.bf16.mxu0 %v7967_v59  ;;  %4975 = vmatpush3.bf16.msra.mxu1 %v7966_v56  ;;  %v5008_v38 = vpack.c.bf16 %v7992_v5, %v7991_v13  ;;  %v5404_v16 = vpack.c.bf16 %v8004_v4, %v8003_v11 }
 0x1ea   : > { %4977 = vmatprep.subr.bf16.mxu1 %v7968_v21 }
 0x1ec   : > { %5359 = vmatpush3.bf16.msra.mxu0 %v7967_v59 }
 0x1ed   : > { %5361 = vmatprep.subr.bf16.mxu0 %v7969_v6  ;;  %4979 = vmatpush3.bf16.msra.mxu1 %v7968_v21 }
 0x1ee   : > { %4981 = vmatprep.subr.bf16.mxu1 %v7970_v26 }
 0x1f0   : > { %5363 = vmatpush3.bf16.msra.mxu0 %v7969_v6 }
 0x1f1   : > { %5365 = vmatprep.subr.bf16.mxu0 %v7971_v41  ;;  %4983 = vmatpush3.bf16.msra.mxu1 %v7970_v26 }
 0x1f2   : > { %4985 = vmatprep.subr.bf16.mxu1 %v7972_v55 }
 0x1f4   : > { %5367 = vmatpush3.bf16.msra.mxu0 %v7971_v41 }
 0x1f5   : > { %5369 = vmatprep.subr.bf16.mxu0 %v7973_v9  ;;  %4987 = vmatpush3.bf16.msra.mxu1 %v7972_v55 }
 0x1f6   : > { %4989 = vmatprep.subr.bf16.mxu1 %v7974_v19 }
 0x1f8   : > { %5371 = vmatpush3.bf16.msra.mxu0 %v7973_v9 }
 0x1f9   : > { %5373 = vmatprep.subr.bf16.mxu0 %v7975_v25  ;;  %4991 = vmatpush3.bf16.msra.mxu1 %v7974_v19 }
 0x1fa   : > { %4993 = vmatprep.subr.bf16.mxu1 %v7976_v14 }
 0x1fc   : > { %5375 = vmatpush3.bf16.msra.mxu0 %v7975_v25 }
 0x1fd   : > { %5377 = vmatprep.subr.bf16.mxu0 %v7144_v61  ;;  %4995 = vmatpush3.bf16.msra.mxu1 %v7976_v14 }
 0x1fe   : > { %4997 = vmatprep.subr.bf16.mxu1 %v4996_v0 }
 0x200   : > { %5379 = vmatpush3.bf16.msra.mxu0 %v7144_v61  ;;  %4184 = vmatmul.mubr.f32.vlgmr.msra.gmra.mrb[0].mxu1 %v7983_v30  ;;  %v5024_v30 = vpack.c.bf16 %v8006_v34, %v8005_v54 }
 0x201   : > { %5381 = vmatprep.subr.bf16.mxu0 %v5380_v18  ;;  %4999 = vmatpush3.bf16.msra.mxu1 %v4996_v0  ;;  %v5012_v0 = vpack.c.bf16 %v7996_v17, %v7995_v37 }
 0x202   : > { %4218 = vmatprep.mubr.f32.mxu1 %v6729_v28  ;;  %5001 = vmatprep.subr.bf16.mxu1 %v5000_v36 }
 0x203   : > { %4604 = vmatmul.mubr.f32.vlgmr.msra.gmra.mrb[0].mxu0 %v7986_v22 }
 0x204   : > { %5383 = vmatpush3.bf16.msra.mxu0 %v5380_v18  ;;  %4638 = vmatprep.mubr.f32.mxu0 %v6733_v10  ;;  %v5392_v18 = vpack.c.bf16 %v7994_v8, %v7993_v58 }
 0x205   : > { %5385 = vmatprep.subr.bf16.mxu0 %v5384_v32  ;;  %5003 = vmatpush3.bf16.msra.mxu1 %v5000_v36  ;;  %v5400_v36 = vpack.c.bf16 %v8001_v60, %v8000_v23 }
 0x206   : > { %5005 = vmatprep.subr.bf16.mxu1 %v5004_v47 }
 0x208   : > { %5387 = vmatpush3.bf16.msra.mxu0 %v5384_v32 }
 0x209   : > { %5389 = vmatprep.subr.bf16.mxu0 %v5388_v3  ;;  %5007 = vmatpush3.bf16.msra.mxu1 %v5004_v47 }
 0x20a   : > { %5009 = vmatprep.subr.bf16.mxu1 %v5008_v38 }
 0x20c   : > { %5391 = vmatpush3.bf16.msra.mxu0 %v5388_v3 }
 0x20d   : > { %5393 = vmatprep.subr.bf16.mxu0 %v5392_v18  ;;  %5011 = vmatpush3.bf16.msra.mxu1 %v5008_v38 }
 0x20e   : > { %5013 = vmatprep.subr.bf16.mxu1 %v5012_v0 }
 0x210   : > { %5395 = vmatpush3.bf16.msra.mxu0 %v5392_v18 }
 0x211   : > { %5397 = vmatprep.subr.bf16.mxu0 %v5396_v45  ;;  %5015 = vmatpush3.bf16.msra.mxu1 %v5012_v0 }
 0x212   : > { %5017 = vmatprep.subr.bf16.mxu1 %v5016_v33 }
 0x214   : > { %5399 = vmatpush3.bf16.msra.mxu0 %v5396_v45 }
 0x215   : > { %5401 = vmatprep.subr.bf16.mxu0 %v5400_v36  ;;  %5019 = vmatpush3.bf16.msra.mxu1 %v5016_v33 }
 0x216   : > { %5021 = vmatprep.subr.bf16.mxu1 %v5020_v39 }
 0x218   : > { %5403 = vmatpush3.bf16.msra.mxu0 %v5400_v36 }
 0x219   : > { %5405 = vmatprep.subr.bf16.mxu0 %v5404_v16  ;;  %5023 = vmatpush3.bf16.msra.mxu1 %v5020_v39 }
 0x21a   : > { %5025 = vmatprep.subr.bf16.mxu1 %v5024_v30 }
 0x21c   : > { %5407 = vmatpush3.bf16.msra.mxu0 %v5404_v16 }
 0x21d   : > { %5409 = vmatprep.subr.bf16.mxu0 %v5408_v35  ;;  %5027 = vmatpush3.bf16.msra.mxu1 %v5024_v30 }
 0x21e   : > { %5029 = vmatprep.subr.bf16.mxu1 %v7958_v46 }
 0x220   : > { %5411 = vmatpush3.bf16.msra.mxu0 %v5408_v35  ;;  %4219 = vmatmul.mubr.f32.vlgmr.msra.gmra.mrb[0].mxu1 %v6760_v7 }
 0x221   : > { %5413 = vmatprep.subr.bf16.mxu0 %v7960_v62  ;;  %5031 = vmatpush3.bf16.msra.mxu1 %v7958_v46 }
 0x222   : > { %4253 = vmatprep.mubr.f32.mxu1 %v6729_v28  ;;  %5033 = vmatprep.subr.bf16.mxu1 %v7963_v57 }
 0x223   : > { %4639 = vmatmul.mubr.f32.vlgmr.msra.gmra.mrb[0].mxu0 %v6765_v51 }
 0x224   : > { %5415 = vmatpush3.bf16.msra.mxu0 %v7960_v62  ;;  %4673 = vmatprep.mubr.f32.mxu0 %v6733_v10 }
 0x225   : > { %5417 = vmatprep.subr.bf16.mxu0 %v7965_v12  ;;  %5035 = vmatpush3.bf16.msra.mxu1 %v7963_v57 }
 0x226   : > { %5037 = vmatprep.subr.bf16.mxu1 %v7966_v56 }
 0x228   : > { %5419 = vmatpush3.bf16.msra.mxu0 %v7965_v12 }
 0x229   : > { %5421 = vmatprep.subr.bf16.mxu0 %v7967_v59  ;;  %5039 = vmatpush3.bf16.msra.mxu1 %v7966_v56 }
 0x22a   : > { %5041 = vmatprep.subr.bf16.mxu1 %v7968_v21 }
 0x22c   : > { %5423 = vmatpush3.bf16.msra.mxu0 %v7967_v59 }
 0x22d   : > { %5425 = vmatprep.subr.bf16.mxu0 %v7969_v6  ;;  %5043 = vmatpush3.bf16.msra.mxu1 %v7968_v21 }
 0x22e   : > { %5045 = vmatprep.subr.bf16.mxu1 %v7970_v26 }
 0x230   : > { %5427 = vmatpush3.bf16.msra.mxu0 %v7969_v6 }
 0x231   : > { %5429 = vmatprep.subr.bf16.mxu0 %v7971_v41  ;;  %5047 = vmatpush3.bf16.msra.mxu1 %v7970_v26 }
 0x232   : > { %5049 = vmatprep.subr.bf16.mxu1 %v7972_v55 }
 0x234   : > { %5431 = vmatpush3.bf16.msra.mxu0 %v7971_v41 }
 0x235   : > { %5433 = vmatprep.subr.bf16.mxu0 %v7973_v9  ;;  %5051 = vmatpush3.bf16.msra.mxu1 %v7972_v55 }
 0x236   : > { %5053 = vmatprep.subr.bf16.mxu1 %v7974_v19 }
 0x238   : > { %5435 = vmatpush3.bf16.msra.mxu0 %v7973_v9 }
 0x239   : > { %5437 = vmatprep.subr.bf16.mxu0 %v7975_v25  ;;  %5055 = vmatpush3.bf16.msra.mxu1 %v7974_v19 }
 0x23a   : > { %5057 = vmatprep.subr.bf16.mxu1 %v7976_v14 }
 0x23c   : > { %5439 = vmatpush3.bf16.msra.mxu0 %v7975_v25 }
 0x23d   : > { %5441 = vmatprep.subr.bf16.mxu0 %v7144_v61  ;;  %5059 = vmatpush3.bf16.msra.mxu1 %v7976_v14 }
 0x240   : > { %5443 = vmatpush3.bf16.msra.mxu0 %v7144_v61  ;;  %4254 = vmatmul.mubr.f32.vlgmr.msra.gmra.mrb[0].mxu1 %v6760_v7  ;;  %v3401_v7 = vld [vmem:[%s7546_s2] ss:$0 sm:$0xff] (!%p3400_p8) }
 0x243   : > { %4674 = vmatmul.mubr.f32.vlgmr.msra.gmra.mrb[0].mxu0 %v6765_v51 }
 0x313   : > { %v4255_v28 = vpop.f32.mrb[0].mxu1 }
 0x314   : > { %v1767_v10 = vpop.f32.mrb[1].mxu1 }
 0x316   : > { %v4675_v53 = vpop.f32.mrb[0].mxu0  ;;  %3293 = sbr.rel (%p3400_p8) target bundleno = 807 (0x327), region = 40 }
 0x317   : > { %v5444_v44 = vadd.f32 %v4675_v53, %v4255_v28  ;;  %v3271_v27 = vpop.f32.mrb[1].mxu0 }
 0x318   : > { %v5445_v43 = vadd.f32 %v3271_v27, %v1767_v10 }
 0x319   : > { %v3286_v46 = vadd.f32 %v5444_v44, %v3284_v49 }
 0x31a   : > { %v3285_v62 = vadd.f32 %v5445_v43, %v3283_v29 }
 0x31b   : > { %3289 = vst.msk [vmem:[#allocation2 + $0x8] sm:$0xff] %vm3287_vm5, %v3286_v46 }
 0x31c   : > { %3288 = vst.msk [vmem:[#allocation2] sm:$0xff] %vm3287_vm5, %v3285_v62 }
 0x322   : > { %v3295_v51 = vld [vmem:[#allocation2 + $0x8] sm:$0xff] }
 0x323   : > { %v3294_v61 = vld [vmem:[#allocation2] sm:$0xff]  ;;  %v3304_v12 = vadd.f32 %v3401_v7, %v3295_v51 }
 0x324   : > { %v3303_v57 = vadd.f32 %v3401_v7, %v3294_v61 }
 0x325   : > { %3306 = vst.msk [vmem:[%s5666_s4 + $0x8] sm:$0xff] %vm3287_vm5, %v3304_v12 }
 0x326   : > { %3305 = vst.msk [vmem:[%s5666_s4] sm:$0xff] %vm3287_vm5, %v3303_v57 }
 0x327 PF: > { %s13_s16 = sadd.s32 1, %s5591_s16   ;;  %s8009_s12 = smov %s5583_s14 }
 0x328   : > { %p10_p9 = scmp.ge.s32.totalorder %s13_s16, 6   ;;  %s8010_s13 = smov %s5587_s15 }
 0x329   : > { %s8011_s14 = smov %s8014_s17  ;;  %s8012_s15 = smov %s8018_s18 }
 0x32a   :  { %12 = sbr.rel (!%p10_p9) target bundleno = 3 (0x3), region = 73 }

</bundles_post_ra>
